<compile_context>
chip_gen: v6e
topology: v6e:2x2x1
jax: 0.10.0
libtpu: 0.0.40
codegen_flags: <defaults>
</compile_context>

<pallas_src>
import functools

import jax
import jax.numpy as jnp
import numpy as np
from jax import lax
from jax.experimental import pallas as pl
from jax.experimental.pallas import tpu as pltpu

EPS = 1e-5
LANE = 128


def _round_up(x, m):
    return (x + m - 1) // m * m


def _vmem_budget():
    """Generation-aware VMEM request: ~3/4 of physical, capped at 96 MiB."""
    cap = 64 * 1024 * 1024
    try:
        info = pltpu.get_tpu_info()
        cap = int(getattr(info, "vmem_capacity_bytes", cap) or cap)
    except Exception:
        pass
    return min(cap * 3 // 4, 96 * 1024 * 1024)


_VMEM_LIMIT = _vmem_budget()
# Bigger tiles on 128-MiB chips (v5e/v6e), smaller on v7x (64 MiB physical).
_TARGET_M = 1024 if _VMEM_LIMIT >= 80 * 1024 * 1024 else 512   # conv M-tile rows
_BLOCK_M = 2048 if _VMEM_LIMIT >= 80 * 1024 * 1024 else 1024   # epilogue M tile


def _cparams(n_axes):
    return pltpu.CompilerParams(
        dimension_semantics=("parallel",) * n_axes,
        vmem_limit_bytes=_VMEM_LIMIT,
    )


def _row_tile(ho, wo, target_m):
    """Largest divisor `th` of ho with th*wo <= target_m (at least 1)."""
    th = 1
    for cand in range(1, ho + 1):
        if ho % cand == 0 and cand * wo <= target_m:
            th = cand
    return th


# --------------------------------------------------------------------------- #
# Kernel 1: fused conv (1x1 or 3x3, arbitrary stride), M-tiled over output
# rows, taps concatenated along K into a single MXU matmul per tile.  Emits
# the RAW (pre-BN) bf16 activation plus per-(image,row-tile) channel
# (sum, sum^2) partials.  Optionally folds the previous layer's BN+ReLU into
# its read (used for conv3 <- BN2+ReLU).
# --------------------------------------------------------------------------- #
def _conv_taps_kernel(*refs, taps, stride, th, wo, cin, in_affine, tiled_input):
    if in_affine:
        x_ref, w_ref, si_ref, shi_ref, y_ref, st_ref = refs
    else:
        x_ref, w_ref, y_ref, st_ref = refs

    r = pl.program_id(1)
    row0 = 0 if tiled_input else r * (th * stride)   # padded-input row origin
    cout = w_ref.shape[-1]
    tm = th * wo

    patches = []
    for _t, (dy, dx) in enumerate(taps):
        # Rows row0+dy, +s, ..., +s*(th-1): contiguous leading-dim slice +
        # leading-dim reshape + phase-0 select (input padded so in-bounds).
        slab = x_ref[0, pl.ds(row0 + dy, stride * th)]        # (s*th, Wq, s*cin)
        if stride > 1:
            slab = slab.reshape(th, stride, slab.shape[1], slab.shape[2])[:, 0]
        # Columns via the wrapper's W space-to-depth:
        #   padded col (ox*s + dx) -> (wq = ox + dx//s, phase = dx % s).
        w_off, ph = dx // stride, dx % stride
        patch = slab[:, w_off:w_off + wo, ph * cin:(ph + 1) * cin]   # (th,wo,cin)
        patch = patch.reshape(tm, cin)
        if in_affine:   # fold previous layer's BN + ReLU into this kernel's read
            patch = jnp.maximum(
                patch.astype(jnp.float32) * si_ref[...] + shi_ref[...], 0.0
            ).astype(jnp.bfloat16)
        patches.append(patch)

    # One deep matmul: (tm, T*cin) x (T*cin, cout), f32 accumulation on MXU.
    big = patches[0] if len(patches) == 1 else jnp.concatenate(patches, axis=-1)
    acc = jnp.dot(big, w_ref[...], preferred_element_type=jnp.float32)

    y_ref[0] = acc.reshape(th, wo, cout).astype(y_ref.dtype)
    csum = jnp.sum(acc, axis=0, keepdims=True)          # (1, cout)
    csq = jnp.sum(acc * acc, axis=0, keepdims=True)     # (1, cout)
    st_ref[0, 0] = jnp.concatenate([csum, csq], axis=0)  # (2, cout)


def conv_taps(x_img, w_flat, *, taps, stride, ho, wo, tiled_input,
              in_affine=None, target_m=None):
    """x_img: if tiled_input: (N, ho, wo, Cin) bf16 (1x1 conv, stride 1);
              else:           (N, Hp, Wq, stride*Cin) bf16 (padded + W s2d).
    w_flat: (T*Cin, Cout) bf16, K laid out as [tap0 Cin | tap1 Cin | ...].
    Returns (raw y (N, ho, wo, Cout) bf16,
             stats (N, row_tiles, 2, Cout) f32 = [sum, sum^2])."""
    n = x_img.shape[0]
    nt = len(taps)
    k, cout = w_flat.shape
    cin = k // nt
    th = _row_tile(ho, wo, target_m or _TARGET_M)
    nr = ho // th

    kernel = functools.partial(
        _conv_taps_kernel, taps=taps, stride=stride, th=th, wo=wo, cin=cin,
        in_affine=in_affine is not None, tiled_input=tiled_input)

    if tiled_input:
        assert stride == 1 and nt == 1 and x_img.shape[1:] == (ho, wo, cin)
        x_spec = pl.BlockSpec((1, th, wo, cin), lambda i, r: (i, r, 0, 0))
    else:
        _, hp, wq, scin = x_img.shape
        assert scin == stride * cin
        # Whole padded image resident per n (block index constant over r):
        # needed for the 3x3 halo.
        # TODO(synk): replace with an in-kernel halo DMA for very large images.
        x_spec = pl.BlockSpec((1, hp, wq, scin), lambda i, r: (i, 0, 0, 0))

    in_specs = [x_spec, pl.BlockSpec((k, cout), lambda i, r: (0, 0))]
    args = [x_img, w_flat]
    if in_affine is not None:
        si, shi = in_affine
        in_specs += [pl.BlockSpec((1, cin), lambda i, r: (0, 0)),
                     pl.BlockSpec((1, cin), lambda i, r: (0, 0))]
        args += [si, shi]

    out_shape = (jax.ShapeDtypeStruct((n, ho, wo, cout), jnp.bfloat16),
                 jax.ShapeDtypeStruct((n, nr, 2, cout), jnp.float32))
    out_specs = (pl.BlockSpec((1, th, wo, cout), lambda i, r: (i, r, 0, 0)),
                 pl.BlockSpec((1, 1, 2, cout), lambda i, r: (i, r, 0, 0)))

    return pl.pallas_call(
        kernel,
        grid=(n, nr),
        in_specs=in_specs,
        out_specs=out_specs,
        out_shape=out_shape,
        compiler_params=_cparams(2),
    )(*args)


# --------------------------------------------------------------------------- #
# Kernel 2: fused BN3-affine + shortcut-BN-affine + add + ReLU, M-tiled,
# lane-dense bf16 output.
# --------------------------------------------------------------------------- #
def _residual_kernel(y3_ref, ys_ref, s3_ref, sh3_ref, ss_ref, shs_ref, o_ref):
    y3 = y3_ref[...].astype(jnp.float32)
    ys = ys_ref[...].astype(jnp.float32)
    out = y3 * s3_ref[...] + sh3_ref[...] + ys * ss_ref[...] + shs_ref[...]
    o_ref[...] = jnp.maximum(out, 0.0).astype(o_ref.dtype)


def residual_finalize(y3, ys, s3, sh3, ss, shs, *, block_m=None):
    m, c = y3.shape
    bm = block_m or _BLOCK_M
    tm = min(bm, _round_up(m, 8))
    mp = _round_up(m, tm)
    if mp != m:
        y3 = jnp.pad(y3, ((0, mp - m), (0, 0)))
        ys = jnp.pad(ys, ((0, mp - m), (0, 0)))
    out = pl.pallas_call(
        _residual_kernel,
        grid=(mp // tm,),
        in_specs=[pl.BlockSpec((tm, c), lambda i: (i, 0)),
                  pl.BlockSpec((tm, c), lambda i: (i, 0)),
                  pl.BlockSpec((1, c), lambda i: (0, 0)),
                  pl.BlockSpec((1, c), lambda i: (0, 0)),
                  pl.BlockSpec((1, c), lambda i: (0, 0)),
                  pl.BlockSpec((1, c), lambda i: (0, 0))],
        out_specs=pl.BlockSpec((tm, c), lambda i: (i, 0)),
        out_shape=jax.ShapeDtypeStruct((mp, c), jnp.bfloat16),
        compiler_params=_cparams(1),
    )(y3, ys, s3, sh3, ss, shs)
    return out[:m]


# --------------------------------------------------------------------------- #
# Tiny JAX helpers: fold BN batch stats into per-channel scale/shift, padding.
# --------------------------------------------------------------------------- #
def fold_bn(stats, gamma_p, beta_p, m):
    s = stats.astype(jnp.float32).sum(axis=(0, 1))      # (2, C)
    mean = s[0] / m
    var = jnp.maximum(s[1] / m - mean * mean, 0.0)      # biased var (PyTorch)
    scale = gamma_p * lax.rsqrt(var + EPS)
    shift = beta_p - mean * scale
    return scale.reshape(1, -1), shift.reshape(1, -1)


def _pad_last(x, c_to):
    c = x.shape[-1]
    if c == c_to:
        return x
    return jnp.pad(x, [(0, 0)] * (x.ndim - 1) + [(0, c_to - c)])


def _pad_vec(v, c_to):
    v = v.astype(jnp.float32)
    if v.shape[0] == c_to:
        return v
    return jnp.concatenate([v, jnp.zeros((c_to - v.shape[0],), jnp.float32)])


def _prep_weight_1x1(w, cin_p, cout_p):
    cout, cin = w.shape[:2]
    wm = jnp.zeros((cin_p, cout_p), jnp.float32)
    wm = wm.at[:cin, :cout].set(w.reshape(cout, cin).T)
    return wm.astype(jnp.bfloat16)                       # (Cin_p, Cout_p)


def _prep_weight_3x3(w, cin_p, cout_p):
    cout, cin = w.shape[:2]
    wt = jnp.transpose(w, (2, 3, 1, 0)).reshape(9, cin, cout)    # (dy,dx) order
    wm = jnp.zeros((9, cin_p, cout_p), jnp.float32)
    wm = wm.at[:, :cin, :cout].set(wt)
    return wm.reshape(9 * cin_p, cout_p).astype(jnp.bfloat16)    # K = 9*Cin_p


# --------------------------------------------------------------------------- #
# Bottleneck forward
# --------------------------------------------------------------------------- #
def bottleneck_forward(x_nchw, params, stride):
    n, cin, h, w = x_nchw.shape
    cmid = params["w1"].shape[0]
    cexp = params["w3"].shape[0]
    cin_p, cmid_p, cexp_p = (_round_up(c, LANE) for c in (cin, cmid, cexp))

    ho = (h - 1) // stride + 1
    wo = (w - 1) // stride + 1
    m1 = n * h * w
    m2 = n * ho * wo

    taps1 = ((0, 0),)
    taps9 = tuple((dy, dx) for dy in range(3) for dx in range(3))

    x_nhwc = jnp.transpose(x_nchw, (0, 2, 3, 1)).astype(jnp.float32)
    x_p = _pad_last(x_nhwc, cin_p).astype(jnp.bfloat16)          # (n,h,w,cin_p)

    # ---- conv1 (1x1, stride 1), row-tiled input; raw output + bn1 stats ----
    w1 = _prep_weight_1x1(params["w1"], cin_p, cmid_p)
    y1, st1 = conv_taps(x_p, w1, taps=taps1, stride=1, ho=h, wo=w,
                        tiled_input=True)
    s1, sh1 = fold_bn(st1, _pad_vec(params["g1"], cmid_p),
                      _pad_vec(params["b1"], cmid_p), m1)

    # ---- bn1 + relu, fused by XLA into the spatial pad / W space-to-depth
    #      conv2's input needs anyway --------------------------------------
    # TODO(synk): move this halo / space-to-depth prep into the conv2 kernel
    # (in-VMEM padded scratch + border mask) to remove this HBM pass.
    out1 = jnp.maximum(y1.astype(jnp.float32) * s1.reshape(1, 1, 1, -1)
                       + sh1.reshape(1, 1, 1, -1), 0.0).astype(jnp.bfloat16)
    hp = h + 2 + (stride - 1)
    wq = -(-(w + 2 + (stride - 1)) // stride)
    wp = wq * stride
    x2 = jnp.pad(out1, ((0, 0), (1, hp - h - 1), (1, wp - w - 1), (0, 0)))
    x2 = x2.reshape(n, hp, wq, stride * cmid_p)          # W space-to-depth

    # ---- conv2 (3x3, stride, K-concatenated taps) raw + bn2 stats ----------
    w2 = _prep_weight_3x3(params["w2"], cmid_p, cmid_p)
    y2, st2 = conv_taps(x2, w2, taps=taps9, stride=stride, ho=ho, wo=wo,
                        tiled_input=False)
    s2, sh2 = fold_bn(st2, _pad_vec(params["g2"], cmid_p),
                      _pad_vec(params["b2"], cmid_p), m2)

    # ---- conv3 (1x1) with bn2+relu folded into the kernel read -------------
    w3 = _prep_weight_1x1(params["w3"], cmid_p, cexp_p)
    y3, st3 = conv_taps(y2, w3, taps=taps1, stride=1, ho=ho, wo=wo,
                        tiled_input=True, in_affine=(s2, sh2))
    s3, sh3 = fold_bn(st3, _pad_vec(params["g3"], cexp_p),
                      _pad_vec(params["b3"], cexp_p), m2)

    # ---- shortcut -----------------------------------------------------------
    if stride != 1 or cin != cexp:
        # Subsample in XLA (fused with the channel-pad/cast) so the shortcut
        # conv only DMAs the 1/stride^2 pixels it actually consumes.
        xs = x_p[:, ::stride, ::stride, :] if stride > 1 else x_p
        wsm = _prep_weight_1x1(params["ws"], cin_p, cexp_p)
        ys, sts = conv_taps(xs, wsm, taps=taps1, stride=1, ho=ho, wo=wo,
                            tiled_input=True)
        ss, shs = fold_bn(sts, _pad_vec(params["gs"], cexp_p),
                          _pad_vec(params["bs"], cexp_p), m2)
        ys_flat = ys.reshape(m2, cexp_p)
    else:                                                # identity shortcut
        ys_flat = x_p.reshape(m2, cexp_p)
        ss = jnp.ones((1, cexp_p), jnp.float32)
        shs = jnp.zeros((1, cexp_p), jnp.float32)

    # ---- bn3 + shortcut bn + add + relu (fused, M-tiled, bf16 lane-dense) ---
    out = residual_finalize(y3.reshape(m2, cexp_p), ys_flat, s3, sh3, ss, shs)
    out = out[:, :cexp].reshape(n, ho, wo, cexp)
    return jnp.transpose(out, (0, 3, 1, 2)).astype(jnp.float32)   # NCHW


# --------------------------------------------------------------------------- #
# Pure-JAX f32 reference (PyTorch semantics: training-mode BN, eps=1e-5)
# --------------------------------------------------------------------------- #
def _ref_forward(x, params, stride):
    def conv(x, w, s=1, pad="VALID"):
        return lax.conv_general_dilated(
            x, w, (s, s), pad, dimension_numbers=("NCHW", "OIHW", "NCHW"))

    def bn(y, g, b):
        mean = y.mean(axis=(0, 2, 3), keepdims=True)
        var = ((y - mean) ** 2).mean(axis=(0, 2, 3), keepdims=True)
        return (y - mean) / jnp.sqrt(var + EPS) * g.reshape(1, -1, 1, 1) \
               + b.reshape(1, -1, 1, 1)

    out = jax.nn.relu(bn(conv(x, params["w1"]), params["g1"], params["b1"]))
    out = jax.nn.relu(bn(conv(out, params["w2"], stride, ((1, 1), (1, 1))),
                         params["g2"], params["b2"]))
    out = bn(conv(out, params["w3"]), params["g3"], params["b3"])
    if "ws" in params:
        sc = bn(conv(x, params["ws"], stride), params["gs"], params["bs"])
    else:
        sc = x
    return jax.nn.relu(out + sc)


# --------------------------------------------------------------------------- #
def _make_params(key, cin, cmid, cexp, stride):
    k = jax.random.split(key, 5)
    params = {
        "w1": 0.1 * jax.random.normal(k[0], (cmid, cin, 1, 1), jnp.float32),
        "g1": jnp.ones((cmid,), jnp.float32), "b1": jnp.zeros((cmid,), jnp.float32),
        "w2": 0.1 * jax.random.normal(k[1], (cmid, cmid, 3, 3), jnp.float32),
        "g2": jnp.ones((cmid,), jnp.float32), "b2": jnp.zeros((cmid,), jnp.float32),
        "w3": 0.1 * jax.random.normal(k[2], (cexp, cmid, 1, 1), jnp.float32),
        "g3": jnp.ones((cexp,), jnp.float32), "b3": jnp.zeros((cexp,), jnp.float32),
    }
    if stride != 1 or cin != cexp:
        params["ws"] = 0.1 * jax.random.normal(k[3], (cexp, cin, 1, 1), jnp.float32)
        params["gs"] = jnp.ones((cexp,), jnp.float32)
        params["bs"] = jnp.zeros((cexp,), jnp.float32)
    return params


def _run_case(key, n, cin, h, w, out_channels, stride):
    expansion = 4
    cmid, cexp = out_channels, out_channels * expansion
    kx, kp = jax.random.split(key)
    x = jax.random.normal(kx, (n, cin, h, w), jnp.float32)
    params = _make_params(kp, cin, cmid, cexp, stride)

    fwd = jax.jit(bottleneck_forward, static_argnames=("stride",))
    out = jax.block_until_ready(fwd(x, params, stride))
    ref = jax.block_until_ready(_ref_forward(x, params, stride))

    ho, wo = (h - 1) // stride + 1, (w - 1) // stride + 1
    assert out.shape == (n, cexp, ho, wo), out.shape
    # bf16 MXU operands + bf16 epilogue -> looser tolerance than pure f32.
    np.testing.assert_allclose(np.asarray(out), np.asarray(ref),
                               rtol=5e-2, atol=5e-2)


if __name__ == "__main__":
    key = jax.random.PRNGKey(0)
    k1, k2 = jax.random.split(key)
    # Projection shortcut (stride=2, Cin != Cexp).
    _run_case(k1, n=2, cin=8, h=16, w=16, out_channels=4, stride=2)
    # Identity shortcut (stride=1, Cin == Cexp).
    _run_case(k2, n=2, cin=16, h=8, w=8, out_channels=4, stride=1)
    print("KERNEL_OK")
</pallas_src>

<mosaic_0001>
module attributes {stable_mosaic.version = 11 : i64} {
  func.func @_conv_taps_kernel(%arg0: i32, %arg1: i32, %arg2: memref<1x16x16x128xbf16, #tpu.memory_space<vmem>>, %arg3: memref<128x128xbf16, #tpu.memory_space<vmem>>, %arg4: memref<1x16x16x128xbf16, #tpu.memory_space<vmem>>, %arg5: memref<1x1x2x128xf32, #tpu.memory_space<vmem>>) attributes {dimension_semantics = [#tpu.dimension_semantics<parallel>, #tpu.dimension_semantics<parallel>], iteration_bounds = array<i64: 2, 1>, scalar_prefetch = 0 : i64, scratch_operands = 0 : i64, tpu.core_type = #tpu.core_type<tc>, window_params = [{transform_indices = @transform_0, window_bounds = array<i64: 1, 16, 16, 128>}, {pipeline_mode = #tpu.pipeline_mode<synchronous>, transform_indices = @transform_1, window_bounds = array<i64: 128, 128>}, {transform_indices = @transform_2, window_bounds = array<i64: 1, 16, 16, 128>}, {transform_indices = @transform_3, window_bounds = array<i64: 1, 1, 2, 128>}]} {
    %c0 = arith.constant 0 : index
    %c0_0 = arith.constant 0 : index
    %c0_1 = arith.constant 0 : index
    %c0_2 = arith.constant 0 : index
    %0 = vector.load %arg2[%c0, %c0_0, %c0_1, %c0_2] : memref<1x16x16x128xbf16, #tpu.memory_space<vmem>>, vector<1x16x16x128xbf16>
    %1 = vector.shape_cast %0 : vector<1x16x16x128xbf16> to vector<16x16x128xbf16>
    %2 = vector.shape_cast %1 : vector<16x16x128xbf16> to vector<256x128xbf16>
    %c0_3 = arith.constant 0 : index
    %c0_4 = arith.constant 0 : index
    %3 = vector.load %arg3[%c0_3, %c0_4] : memref<128x128xbf16, #tpu.memory_space<vmem>>, vector<128x128xbf16>
    %cst = arith.constant dense<0.000000e+00> : vector<256x128xf32>
    %4 = tpu.matmul %2, %3, %cst {dimension_numbers = #tpu.dot_dimension_numbers<[1], [0], [0], [1], [0, 0, 1, 1], [], []>} : vector<256x128xbf16>, vector<128x128xbf16>, vector<256x128xf32> -> vector<256x128xf32>
    %5 = vector.shape_cast %4 : vector<256x128xf32> to vector<16x16x128xf32>
    %6 = arith.truncf %5 : vector<16x16x128xf32> to vector<16x16x128xbf16>
    %c0_5 = arith.constant 0 : index
    %c0_6 = arith.constant 0 : index
    %c0_7 = arith.constant 0 : index
    %c0_8 = arith.constant 0 : index
    %7 = vector.load %arg4[%c0_5, %c0_6, %c0_7, %c0_8] : memref<1x16x16x128xbf16, #tpu.memory_space<vmem>>, vector<1x16x16x128xbf16>
    %8 = vector.shape_cast %7 : vector<1x16x16x128xbf16> to vector<16x16x128xbf16>
    %9 = vector.shape_cast %6 : vector<16x16x128xbf16> to vector<1x16x16x128xbf16>
    tpu.vector_store %arg4[%c0_5, %c0_6, %c0_7, %c0_8], %9 {strides = array<i32>} : memref<1x16x16x128xbf16, #tpu.memory_space<vmem>>, vector<1x16x16x128xbf16>,
    %cst_9 = arith.constant dense<0.000000e+00> : vector<128xf32>
    %10 = vector.multi_reduction <add>, %4, %cst_9 [0] : vector<256x128xf32> to vector<128xf32>
    %11 = vector.shape_cast %10 : vector<128xf32> to vector<1x128xf32>
    %12 = arith.mulf %4, %4 : vector<256x128xf32>
    %cst_10 = arith.constant dense<0.000000e+00> : vector<128xf32>
    %13 = vector.multi_reduction <add>, %12, %cst_10 [0] : vector<256x128xf32> to vector<128xf32>
    %14 = vector.shape_cast %13 : vector<128xf32> to vector<1x128xf32>
    %15 = tpu.concatenate %11, %14 in 0 : vector<1x128xf32>, vector<1x128xf32> -> vector<2x128xf32>
    %c0_11 = arith.constant 0 : index
    %c0_12 = arith.constant 0 : index
    %c0_13 = arith.constant 0 : index
    %c0_14 = arith.constant 0 : index
    %16 = vector.load %arg5[%c0_11, %c0_12, %c0_13, %c0_14] : memref<1x1x2x128xf32, #tpu.memory_space<vmem>>, vector<1x1x2x128xf32>
    %17 = vector.shape_cast %16 : vector<1x1x2x128xf32> to vector<2x128xf32>
    %18 = vector.shape_cast %15 : vector<2x128xf32> to vector<1x1x2x128xf32>
    tpu.vector_store %arg5[%c0_11, %c0_12, %c0_13, %c0_14], %18 {strides = array<i32>} : memref<1x1x2x128xf32, #tpu.memory_space<vmem>>, vector<1x1x2x128xf32>,
    return
  }
  func.func @transform_0(%arg0: i32, %arg1: i32) -> (i32, i32, i32, i32) {
    %c0_i32 = arith.constant 0 : i32
    %c0_i32_0 = arith.constant 0 : i32
    %c0_i32_1 = arith.constant 0 : i32
    return %arg0, %arg1, %c0_i32, %c0_i32_0 : i32, i32, i32, i32
  }
  func.func @transform_1(%arg0: i32, %arg1: i32) -> (i32, i32) {
    %c0_i32 = arith.constant 0 : i32
    %c0_i32_0 = arith.constant 0 : i32
    %c0_i32_1 = arith.constant 0 : i32
    return %c0_i32, %c0_i32_0 : i32, i32
  }
  func.func @transform_2(%arg0: i32, %arg1: i32) -> (i32, i32, i32, i32) {
    %c0_i32 = arith.constant 0 : i32
    %c0_i32_0 = arith.constant 0 : i32
    %c0_i32_1 = arith.constant 0 : i32
    return %arg0, %arg1, %c0_i32, %c0_i32_0 : i32, i32, i32, i32
  }
  func.func @transform_3(%arg0: i32, %arg1: i32) -> (i32, i32, i32, i32) {
    %c0_i32 = arith.constant 0 : i32
    %c0_i32_0 = arith.constant 0 : i32
    %c0_i32_1 = arith.constant 0 : i32
    return %arg0, %arg1, %c0_i32, %c0_i32_0 : i32, i32, i32, i32
  }
}

module attributes {stable_mosaic.version = 11 : i64} {
  func.func @_conv_taps_kernel(%arg0: i32, %arg1: i32, %arg2: memref<1x8x8x128xbf16, #tpu.memory_space<vmem>>, %arg3: memref<128x128xbf16, #tpu.memory_space<vmem>>, %arg4: memref<1x8x8x128xbf16, #tpu.memory_space<vmem>>, %arg5: memref<1x1x2x128xf32, #tpu.memory_space<vmem>>) attributes {dimension_semantics = [#tpu.dimension_semantics<parallel>, #tpu.dimension_semantics<parallel>], iteration_bounds = array<i64: 2, 1>, scalar_prefetch = 0 : i64, scratch_operands = 0 : i64, tpu.core_type = #tpu.core_type<tc>, window_params = [{transform_indices = @transform_0, window_bounds = array<i64: 1, 8, 8, 128>}, {pipeline_mode = #tpu.pipeline_mode<synchronous>, transform_indices = @transform_1, window_bounds = array<i64: 128, 128>}, {transform_indices = @transform_2, window_bounds = array<i64: 1, 8, 8, 128>}, {transform_indices = @transform_3, window_bounds = array<i64: 1, 1, 2, 128>}]} {
    %c0 = arith.constant 0 : index
    %c0_0 = arith.constant 0 : index
    %c0_1 = arith.constant 0 : index
    %c0_2 = arith.constant 0 : index
    %0 = vector.load %arg2[%c0, %c0_0, %c0_1, %c0_2] : memref<1x8x8x128xbf16, #tpu.memory_space<vmem>>, vector<1x8x8x128xbf16>
    %1 = vector.shape_cast %0 : vector<1x8x8x128xbf16> to vector<8x8x128xbf16>
    %2 = vector.shape_cast %1 : vector<8x8x128xbf16> to vector<64x128xbf16>
    %c0_3 = arith.constant 0 : index
    %c0_4 = arith.constant 0 : index
    %3 = vector.load %arg3[%c0_3, %c0_4] : memref<128x128xbf16, #tpu.memory_space<vmem>>, vector<128x128xbf16>
    %cst = arith.constant dense<0.000000e+00> : vector<64x128xf32>
    %4 = tpu.matmul %2, %3, %cst {dimension_numbers = #tpu.dot_dimension_numbers<[1], [0], [0], [1], [0, 0, 1, 1], [], []>} : vector<64x128xbf16>, vector<128x128xbf16>, vector<64x128xf32> -> vector<64x128xf32>
    %5 = vector.shape_cast %4 : vector<64x128xf32> to vector<8x8x128xf32>
    %6 = arith.truncf %5 : vector<8x8x128xf32> to vector<8x8x128xbf16>
    %c0_5 = arith.constant 0 : index
    %c0_6 = arith.constant 0 : index
    %c0_7 = arith.constant 0 : index
    %c0_8 = arith.constant 0 : index
    %7 = vector.load %arg4[%c0_5, %c0_6, %c0_7, %c0_8] : memref<1x8x8x128xbf16, #tpu.memory_space<vmem>>, vector<1x8x8x128xbf16>
    %8 = vector.shape_cast %7 : vector<1x8x8x128xbf16> to vector<8x8x128xbf16>
    %9 = vector.shape_cast %6 : vector<8x8x128xbf16> to vector<1x8x8x128xbf16>
    tpu.vector_store %arg4[%c0_5, %c0_6, %c0_7, %c0_8], %9 {strides = array<i32>} : memref<1x8x8x128xbf16, #tpu.memory_space<vmem>>, vector<1x8x8x128xbf16>,
    %cst_9 = arith.constant dense<0.000000e+00> : vector<128xf32>
    %10 = vector.multi_reduction <add>, %4, %cst_9 [0] : vector<64x128xf32> to vector<128xf32>
    %11 = vector.shape_cast %10 : vector<128xf32> to vector<1x128xf32>
    %12 = arith.mulf %4, %4 : vector<64x128xf32>
    %cst_10 = arith.constant dense<0.000000e+00> : vector<128xf32>
    %13 = vector.multi_reduction <add>, %12, %cst_10 [0] : vector<64x128xf32> to vector<128xf32>
    %14 = vector.shape_cast %13 : vector<128xf32> to vector<1x128xf32>
    %15 = tpu.concatenate %11, %14 in 0 : vector<1x128xf32>, vector<1x128xf32> -> vector<2x128xf32>
    %c0_11 = arith.constant 0 : index
    %c0_12 = arith.constant 0 : index
    %c0_13 = arith.constant 0 : index
    %c0_14 = arith.constant 0 : index
    %16 = vector.load %arg5[%c0_11, %c0_12, %c0_13, %c0_14] : memref<1x1x2x128xf32, #tpu.memory_space<vmem>>, vector<1x1x2x128xf32>
    %17 = vector.shape_cast %16 : vector<1x1x2x128xf32> to vector<2x128xf32>
    %18 = vector.shape_cast %15 : vector<2x128xf32> to vector<1x1x2x128xf32>
    tpu.vector_store %arg5[%c0_11, %c0_12, %c0_13, %c0_14], %18 {strides = array<i32>} : memref<1x1x2x128xf32, #tpu.memory_space<vmem>>, vector<1x1x2x128xf32>,
    return
  }
  func.func @transform_0(%arg0: i32, %arg1: i32) -> (i32, i32, i32, i32) {
    %c0_i32 = arith.constant 0 : i32
    %c0_i32_0 = arith.constant 0 : i32
    %c0_i32_1 = arith.constant 0 : i32
    return %arg0, %arg1, %c0_i32, %c0_i32_0 : i32, i32, i32, i32
  }
  func.func @transform_1(%arg0: i32, %arg1: i32) -> (i32, i32) {
    %c0_i32 = arith.constant 0 : i32
    %c0_i32_0 = arith.constant 0 : i32
    %c0_i32_1 = arith.constant 0 : i32
    return %c0_i32, %c0_i32_0 : i32, i32
  }
  func.func @transform_2(%arg0: i32, %arg1: i32) -> (i32, i32, i32, i32) {
    %c0_i32 = arith.constant 0 : i32
    %c0_i32_0 = arith.constant 0 : i32
    %c0_i32_1 = arith.constant 0 : i32
    return %arg0, %arg1, %c0_i32, %c0_i32_0 : i32, i32, i32, i32
  }
  func.func @transform_3(%arg0: i32, %arg1: i32) -> (i32, i32, i32, i32) {
    %c0_i32 = arith.constant 0 : i32
    %c0_i32_0 = arith.constant 0 : i32
    %c0_i32_1 = arith.constant 0 : i32
    return %arg0, %arg1, %c0_i32, %c0_i32_0 : i32, i32, i32, i32
  }
}

module attributes {stable_mosaic.version = 11 : i64} {
  func.func @_conv_taps_kernel(%arg0: i32, %arg1: i32, %arg2: memref<1x19x10x256xbf16, #tpu.memory_space<vmem>>, %arg3: memref<1152x128xbf16, #tpu.memory_space<vmem>>, %arg4: memref<1x8x8x128xbf16, #tpu.memory_space<vmem>>, %arg5: memref<1x1x2x128xf32, #tpu.memory_space<vmem>>) attributes {dimension_semantics = [#tpu.dimension_semantics<parallel>, #tpu.dimension_semantics<parallel>], iteration_bounds = array<i64: 2, 1>, scalar_prefetch = 0 : i64, scratch_operands = 0 : i64, tpu.core_type = #tpu.core_type<tc>, window_params = [{transform_indices = @transform_0, window_bounds = array<i64: 1, 19, 10, 256>}, {pipeline_mode = #tpu.pipeline_mode<synchronous>, transform_indices = @transform_1, window_bounds = array<i64: 1152, 128>}, {transform_indices = @transform_2, window_bounds = array<i64: 1, 8, 8, 128>}, {transform_indices = @transform_3, window_bounds = array<i64: 1, 1, 2, 128>}]} {
    %c16_i32 = arith.constant 16 : i32
    %0 = arith.muli %arg1, %c16_i32 : i32
    %c0_i32 = arith.constant 0 : i32
    %1 = arith.addi %0, %c0_i32 : i32
    %c0 = arith.constant 0 : index
    %2 = arith.index_cast %1 : i32 to index
    %c0_0 = arith.constant 0 : index
    %c0_1 = arith.constant 0 : index
    %3 = vector.load %arg2[%c0, %2, %c0_0, %c0_1] : memref<1x19x10x256xbf16, #tpu.memory_space<vmem>>, vector<1x16x10x256xbf16>
    %4 = vector.shape_cast %3 : vector<1x16x10x256xbf16> to vector<16x10x256xbf16>
    %5 = vector.shape_cast %4 : vector<16x10x256xbf16> to vector<8x2x10x256xbf16>
    %6 = vector.extract_strided_slice %5 {offsets = [0, 0, 0, 0], sizes = [8, 1, 10, 256], strides = [1, 1, 1, 1]} : vector<8x2x10x256xbf16> to vector<8x1x10x256xbf16>
    %7 = vector.shape_cast %6 : vector<8x1x10x256xbf16> to vector<8x10x256xbf16>
    %8 = vector.extract_strided_slice %7 {offsets = [0, 0, 0], sizes = [8, 8, 128], strides = [1, 1, 1]} : vector<8x10x256xbf16> to vector<8x8x128xbf16>
    %9 = vector.shape_cast %8 : vector<8x8x128xbf16> to vector<64x128xbf16>
    %c0_i32_2 = arith.constant 0 : i32
    %10 = arith.addi %0, %c0_i32_2 : i32
    %c0_3 = arith.constant 0 : index
    %11 = arith.index_cast %10 : i32 to index
    %c0_4 = arith.constant 0 : index
    %c0_5 = arith.constant 0 : index
    %12 = vector.load %arg2[%c0_3, %11, %c0_4, %c0_5] : memref<1x19x10x256xbf16, #tpu.memory_space<vmem>>, vector<1x16x10x256xbf16>
    %13 = vector.shape_cast %12 : vector<1x16x10x256xbf16> to vector<16x10x256xbf16>
    %14 = vector.shape_cast %13 : vector<16x10x256xbf16> to vector<8x2x10x256xbf16>
    %15 = vector.extract_strided_slice %14 {offsets = [0, 0, 0, 0], sizes = [8, 1, 10, 256], strides = [1, 1, 1, 1]} : vector<8x2x10x256xbf16> to vector<8x1x10x256xbf16>
    %16 = vector.shape_cast %15 : vector<8x1x10x256xbf16> to vector<8x10x256xbf16>
    %17 = vector.extract_strided_slice %16 {offsets = [0, 0, 128], sizes = [8, 8, 128], strides = [1, 1, 1]} : vector<8x10x256xbf16> to vector<8x8x128xbf16>
    %18 = vector.shape_cast %17 : vector<8x8x128xbf16> to vector<64x128xbf16>
    %c0_i32_6 = arith.constant 0 : i32
    %19 = arith.addi %0, %c0_i32_6 : i32
    %c0_7 = arith.constant 0 : index
    %20 = arith.index_cast %19 : i32 to index
    %c0_8 = arith.constant 0 : index
    %c0_9 = arith.constant 0 : index
    %21 = vector.load %arg2[%c0_7, %20, %c0_8, %c0_9] : memref<1x19x10x256xbf16, #tpu.memory_space<vmem>>, vector<1x16x10x256xbf16>
    %22 = vector.shape_cast %21 : vector<1x16x10x256xbf16> to vector<16x10x256xbf16>
    %23 = vector.shape_cast %22 : vector<16x10x256xbf16> to vector<8x2x10x256xbf16>
    %24 = vector.extract_strided_slice %23 {offsets = [0, 0, 0, 0], sizes = [8, 1, 10, 256], strides = [1, 1, 1, 1]} : vector<8x2x10x256xbf16> to vector<8x1x10x256xbf16>
    %25 = vector.shape_cast %24 : vector<8x1x10x256xbf16> to vector<8x10x256xbf16>
    %26 = vector.extract_strided_slice %25 {offsets = [0, 1, 0], sizes = [8, 8, 128], strides = [1, 1, 1]} : vector<8x10x256xbf16> to vector<8x8x128xbf16>
    %27 = vector.shape_cast %26 : vector<8x8x128xbf16> to vector<64x128xbf16>
    %c1_i32 = arith.constant 1 : i32
    %28 = arith.addi %0, %c1_i32 : i32
    %c0_10 = arith.constant 0 : index
    %29 = arith.index_cast %28 : i32 to index
    %c0_11 = arith.constant 0 : index
    %c0_12 = arith.constant 0 : index
    %30 = vector.load %arg2[%c0_10, %29, %c0_11, %c0_12] : memref<1x19x10x256xbf16, #tpu.memory_space<vmem>>, vector<1x16x10x256xbf16>
    %31 = vector.shape_cast %30 : vector<1x16x10x256xbf16> to vector<16x10x256xbf16>
    %32 = vector.shape_cast %31 : vector<16x10x256xbf16> to vector<8x2x10x256xbf16>
    %33 = vector.extract_strided_slice %32 {offsets = [0, 0, 0, 0], sizes = [8, 1, 10, 256], strides = [1, 1, 1, 1]} : vector<8x2x10x256xbf16> to vector<8x1x10x256xbf16>
    %34 = vector.shape_cast %33 : vector<8x1x10x256xbf16> to vector<8x10x256xbf16>
    %35 = vector.extract_strided_slice %34 {offsets = [0, 0, 0], sizes = [8, 8, 128], strides = [1, 1, 1]} : vector<8x10x256xbf16> to vector<8x8x128xbf16>
    %36 = vector.shape_cast %35 : vector<8x8x128xbf16> to vector<64x128xbf16>
    %c1_i32_13 = arith.constant 1 : i32
    %37 = arith.addi %0, %c1_i32_13 : i32
    %c0_14 = arith.constant 0 : index
    %38 = arith.index_cast %37 : i32 to index
    %c0_15 = arith.constant 0 : index
    %c0_16 = arith.constant 0 : index
    %39 = vector.load %arg2[%c0_14, %38, %c0_15, %c0_16] : memref<1x19x10x256xbf16, #tpu.memory_space<vmem>>, vector<1x16x10x256xbf16>
    %40 = vector.shape_cast %39 : vector<1x16x10x256xbf16> to vector<16x10x256xbf16>
    %41 = vector.shape_cast %40 : vector<16x10x256xbf16> to vector<8x2x10x256xbf16>
    %42 = vector.extract_strided_slice %41 {offsets = [0, 0, 0, 0], sizes = [8, 1, 10, 256], strides = [1, 1, 1, 1]} : vector<8x2x10x256xbf16> to vector<8x1x10x256xbf16>
    %43 = vector.shape_cast %42 : vector<8x1x10x256xbf16> to vector<8x10x256xbf16>
    %44 = vector.extract_strided_slice %43 {offsets = [0, 0, 128], sizes = [8, 8, 128], strides = [1, 1, 1]} : vector<8x10x256xbf16> to vector<8x8x128xbf16>
    %45 = vector.shape_cast %44 : vector<8x8x128xbf16> to vector<64x128xbf16>
    %c1_i32_17 = arith.constant 1 : i32
    %46 = arith.addi %0, %c1_i32_17 : i32
    %c0_18 = arith.constant 0 : index
    %47 = arith.index_cast %46 : i32 to index
    %c0_19 = arith.constant 0 : index
    %c0_20 = arith.constant 0 : index
    %48 = vector.load %arg2[%c0_18, %47, %c0_19, %c0_20] : memref<1x19x10x256xbf16, #tpu.memory_space<vmem>>, vector<1x16x10x256xbf16>
    %49 = vector.shape_cast %48 : vector<1x16x10x256xbf16> to vector<16x10x256xbf16>
    %50 = vector.shape_cast %49 : vector<16x10x256xbf16> to vector<8x2x10x256xbf16>
    %51 = vector.extract_strided_slice %50 {offsets = [0, 0, 0, 0], sizes = [8, 1, 10, 256], strides = [1, 1, 1, 1]} : vector<8x2x10x256xbf16> to vector<8x1x10x256xbf16>
    %52 = vector.shape_cast %51 : vector<8x1x10x256xbf16> to vector<8x10x256xbf16>
    %53 = vector.extract_strided_slice %52 {offsets = [0, 1, 0], sizes = [8, 8, 128], strides = [1, 1, 1]} : vector<8x10x256xbf16> to vector<8x8x128xbf16>
    %54 = vector.shape_cast %53 : vector<8x8x128xbf16> to vector<64x128xbf16>
    %c2_i32 = arith.constant 2 : i32
    %55 = arith.addi %0, %c2_i32 : i32
    %c0_21 = arith.constant 0 : index
    %56 = arith.index_cast %55 : i32 to index
    %c0_22 = arith.constant 0 : index
    %c0_23 = arith.constant 0 : index
    %57 = vector.load %arg2[%c0_21, %56, %c0_22, %c0_23] : memref<1x19x10x256xbf16, #tpu.memory_space<vmem>>, vector<1x16x10x256xbf16>
    %58 = vector.shape_cast %57 : vector<1x16x10x256xbf16> to vector<16x10x256xbf16>
    %59 = vector.shape_cast %58 : vector<16x10x256xbf16> to vector<8x2x10x256xbf16>
    %60 = vector.extract_strided_slice %59 {offsets = [0, 0, 0, 0], sizes = [8, 1, 10, 256], strides = [1, 1, 1, 1]} : vector<8x2x10x256xbf16> to vector<8x1x10x256xbf16>
    %61 = vector.shape_cast %60 : vector<8x1x10x256xbf16> to vector<8x10x256xbf16>
    %62 = vector.extract_strided_slice %61 {offsets = [0, 0, 0], sizes = [8, 8, 128], strides = [1, 1, 1]} : vector<8x10x256xbf16> to vector<8x8x128xbf16>
    %63 = vector.shape_cast %62 : vector<8x8x128xbf16> to vector<64x128xbf16>
    %c2_i32_24 = arith.constant 2 : i32
    %64 = arith.addi %0, %c2_i32_24 : i32
    %c0_25 = arith.constant 0 : index
    %65 = arith.index_cast %64 : i32 to index
    %c0_26 = arith.constant 0 : index
    %c0_27 = arith.constant 0 : index
    %66 = vector.load %arg2[%c0_25, %65, %c0_26, %c0_27] : memref<1x19x10x256xbf16, #tpu.memory_space<vmem>>, vector<1x16x10x256xbf16>
    %67 = vector.shape_cast %66 : vector<1x16x10x256xbf16> to vector<16x10x256xbf16>
    %68 = vector.shape_cast %67 : vector<16x10x256xbf16> to vector<8x2x10x256xbf16>
    %69 = vector.extract_strided_slice %68 {offsets = [0, 0, 0, 0], sizes = [8, 1, 10, 256], strides = [1, 1, 1, 1]} : vector<8x2x10x256xbf16> to vector<8x1x10x256xbf16>
    %70 = vector.shape_cast %69 : vector<8x1x10x256xbf16> to vector<8x10x256xbf16>
    %71 = vector.extract_strided_slice %70 {offsets = [0, 0, 128], sizes = [8, 8, 128], strides = [1, 1, 1]} : vector<8x10x256xbf16> to vector<8x8x128xbf16>
    %72 = vector.shape_cast %71 : vector<8x8x128xbf16> to vector<64x128xbf16>
    %c2_i32_28 = arith.constant 2 : i32
    %73 = arith.addi %0, %c2_i32_28 : i32
    %c0_29 = arith.constant 0 : index
    %74 = arith.index_cast %73 : i32 to index
    %c0_30 = arith.constant 0 : index
    %c0_31 = arith.constant 0 : index
    %75 = vector.load %arg2[%c0_29, %74, %c0_30, %c0_31] : memref<1x19x10x256xbf16, #tpu.memory_space<vmem>>, vector<1x16x10x256xbf16>
    %76 = vector.shape_cast %75 : vector<1x16x10x256xbf16> to vector<16x10x256xbf16>
    %77 = vector.shape_cast %76 : vector<16x10x256xbf16> to vector<8x2x10x256xbf16>
    %78 = vector.extract_strided_slice %77 {offsets = [0, 0, 0, 0], sizes = [8, 1, 10, 256], strides = [1, 1, 1, 1]} : vector<8x2x10x256xbf16> to vector<8x1x10x256xbf16>
    %79 = vector.shape_cast %78 : vector<8x1x10x256xbf16> to vector<8x10x256xbf16>
    %80 = vector.extract_strided_slice %79 {offsets = [0, 1, 0], sizes = [8, 8, 128], strides = [1, 1, 1]} : vector<8x10x256xbf16> to vector<8x8x128xbf16>
    %81 = vector.shape_cast %80 : vector<8x8x128xbf16> to vector<64x128xbf16>
    %82 = tpu.concatenate %9, %18, %27, %36, %45, %54, %63, %72, %81 in 1 : vector<64x128xbf16>, vector<64x128xbf16>, vector<64x128xbf16>, vector<64x128xbf16>, vector<64x128xbf16>, vector<64x128xbf16>, vector<64x128xbf16>, vector<64x128xbf16>, vector<64x128xbf16> -> vector<64x1152xbf16>
    %c0_32 = arith.constant 0 : index
    %c0_33 = arith.constant 0 : index
    %83 = vector.load %arg3[%c0_32, %c0_33] : memref<1152x128xbf16, #tpu.memory_space<vmem>>, vector<1152x128xbf16>
    %cst = arith.constant dense<0.000000e+00> : vector<64x128xf32>
    %84 = tpu.matmul %82, %83, %cst {dimension_numbers = #tpu.dot_dimension_numbers<[1], [0], [0], [1], [0, 0, 1, 1], [], []>} : vector<64x1152xbf16>, vector<1152x128xbf16>, vector<64x128xf32> -> vector<64x128xf32>
    %85 = vector.shape_cast %84 : vector<64x128xf32> to vector<8x8x128xf32>
    %86 = arith.truncf %85 : vector<8x8x128xf32> to vector<8x8x128xbf16>
    %c0_34 = arith.constant 0 : index
    %c0_35 = arith.constant 0 : index
    %c0_36 = arith.constant 0 : index
    %c0_37 = arith.constant 0 : index
    %87 = vector.load %arg4[%c0_34, %c0_35, %c0_36, %c0_37] : memref<1x8x8x128xbf16, #tpu.memory_space<vmem>>, vector<1x8x8x128xbf16>
    %88 = vector.shape_cast %87 : vector<1x8x8x128xbf16> to vector<8x8x128xbf16>
    %89 = vector.shape_cast %86 : vector<8x8x128xbf16> to vector<1x8x8x128xbf16>
    tpu.vector_store %arg4[%c0_34, %c0_35, %c0_36, %c0_37], %89 {strides = array<i32>} : memref<1x8x8x128xbf16, #tpu.memory_space<vmem>>, vector<1x8x8x128xbf16>,
    %cst_38 = arith.constant dense<0.000000e+00> : vector<128xf32>
    %90 = vector.multi_reduction <add>, %84, %cst_38 [0] : vector<64x128xf32> to vector<128xf32>
    %91 = vector.shape_cast %90 : vector<128xf32> to vector<1x128xf32>
    %92 = arith.mulf %84, %84 : vector<64x128xf32>
    %cst_39 = arith.constant dense<0.000000e+00> : vector<128xf32>
    %93 = vector.multi_reduction <add>, %92, %cst_39 [0] : vector<64x128xf32> to vector<128xf32>
    %94 = vector.shape_cast %93 : vector<128xf32> to vector<1x128xf32>
    %95 = tpu.concatenate %91, %94 in 0 : vector<1x128xf32>, vector<1x128xf32> -> vector<2x128xf32>
    %c0_40 = arith.constant 0 : index
    %c0_41 = arith.constant 0 : index
    %c0_42 = arith.constant 0 : index
    %c0_43 = arith.constant 0 : index
    %96 = vector.load %arg5[%c0_40, %c0_41, %c0_42, %c0_43] : memref<1x1x2x128xf32, #tpu.memory_space<vmem>>, vector<1x1x2x128xf32>
    %97 = vector.shape_cast %96 : vector<1x1x2x128xf32> to vector<2x128xf32>
    %98 = vector.shape_cast %95 : vector<2x128xf32> to vector<1x1x2x128xf32>
    tpu.vector_store %arg5[%c0_40, %c0_41, %c0_42, %c0_43], %98 {strides = array<i32>} : memref<1x1x2x128xf32, #tpu.memory_space<vmem>>, vector<1x1x2x128xf32>,
    return
  }
  func.func @transform_0(%arg0: i32, %arg1: i32) -> (i32, i32, i32, i32) {
    %c0_i32 = arith.constant 0 : i32
    %c0_i32_0 = arith.constant 0 : i32
    %c0_i32_1 = arith.constant 0 : i32
    %c0_i32_2 = arith.constant 0 : i32
    return %arg0, %c0_i32, %c0_i32_0, %c0_i32_1 : i32, i32, i32, i32
  }
  func.func @transform_1(%arg0: i32, %arg1: i32) -> (i32, i32) {
    %c0_i32 = arith.constant 0 : i32
    %c0_i32_0 = arith.constant 0 : i32
    %c0_i32_1 = arith.constant 0 : i32
    return %c0_i32, %c0_i32_0 : i32, i32
  }
  func.func @transform_2(%arg0: i32, %arg1: i32) -> (i32, i32, i32, i32) {
    %c0_i32 = arith.constant 0 : i32
    %c0_i32_0 = arith.constant 0 : i32
    %c0_i32_1 = arith.constant 0 : i32
    return %arg0, %arg1, %c0_i32, %c0_i32_0 : i32, i32, i32, i32
  }
  func.func @transform_3(%arg0: i32, %arg1: i32) -> (i32, i32, i32, i32) {
    %c0_i32 = arith.constant 0 : i32
    %c0_i32_0 = arith.constant 0 : i32
    %c0_i32_1 = arith.constant 0 : i32
    return %arg0, %arg1, %c0_i32, %c0_i32_0 : i32, i32, i32, i32
  }
}

module attributes {stable_mosaic.version = 11 : i64} {
  func.func @_conv_taps_kernel(%arg0: i32, %arg1: i32, %arg2: memref<1x8x8x128xbf16, #tpu.memory_space<vmem>>, %arg3: memref<128x128xbf16, #tpu.memory_space<vmem>>, %arg4: memref<1x128xf32, #tpu.memory_space<vmem>>, %arg5: memref<1x128xf32, #tpu.memory_space<vmem>>, %arg6: memref<1x8x8x128xbf16, #tpu.memory_space<vmem>>, %arg7: memref<1x1x2x128xf32, #tpu.memory_space<vmem>>) attributes {dimension_semantics = [#tpu.dimension_semantics<parallel>, #tpu.dimension_semantics<parallel>], iteration_bounds = array<i64: 2, 1>, scalar_prefetch = 0 : i64, scratch_operands = 0 : i64, tpu.core_type = #tpu.core_type<tc>, window_params = [{transform_indices = @transform_0, window_bounds = array<i64: 1, 8, 8, 128>}, {pipeline_mode = #tpu.pipeline_mode<synchronous>, transform_indices = @transform_1, window_bounds = array<i64: 128, 128>}, {pipeline_mode = #tpu.pipeline_mode<synchronous>, transform_indices = @transform_2, window_bounds = array<i64: 1, 128>}, {pipeline_mode = #tpu.pipeline_mode<synchronous>, transform_indices = @transform_3, window_bounds = array<i64: 1, 128>}, {transform_indices = @transform_4, window_bounds = array<i64: 1, 8, 8, 128>}, {transform_indices = @transform_5, window_bounds = array<i64: 1, 1, 2, 128>}]} {
    %c0 = arith.constant 0 : index
    %c0_0 = arith.constant 0 : index
    %c0_1 = arith.constant 0 : index
    %c0_2 = arith.constant 0 : index
    %0 = vector.load %arg2[%c0, %c0_0, %c0_1, %c0_2] : memref<1x8x8x128xbf16, #tpu.memory_space<vmem>>, vector<1x8x8x128xbf16>
    %1 = vector.shape_cast %0 : vector<1x8x8x128xbf16> to vector<8x8x128xbf16>
    %2 = vector.shape_cast %1 : vector<8x8x128xbf16> to vector<64x128xbf16>
    %3 = arith.extf %2 : vector<64x128xbf16> to vector<64x128xf32>
    %c0_3 = arith.constant 0 : index
    %c0_4 = arith.constant 0 : index
    %4 = vector.load %arg4[%c0_3, %c0_4] : memref<1x128xf32, #tpu.memory_space<vmem>>, vector<1x128xf32>
    %5 = vector.broadcast %4 : vector<1x128xf32> to vector<64x128xf32>
    %6 = arith.mulf %3, %5 : vector<64x128xf32>
    %c0_5 = arith.constant 0 : index
    %c0_6 = arith.constant 0 : index
    %7 = vector.load %arg5[%c0_5, %c0_6] : memref<1x128xf32, #tpu.memory_space<vmem>>, vector<1x128xf32>
    %8 = vector.broadcast %7 : vector<1x128xf32> to vector<64x128xf32>
    %9 = arith.addf %6, %8 : vector<64x128xf32>
    %cst = arith.constant 0.000000e+00 : f32
    %10 = vector.broadcast %cst : f32 to vector<64x128xf32>
    %11 = arith.maximumf %9, %10 : vector<64x128xf32>
    %12 = arith.truncf %11 : vector<64x128xf32> to vector<64x128xbf16>
    %c0_7 = arith.constant 0 : index
    %c0_8 = arith.constant 0 : index
    %13 = vector.load %arg3[%c0_7, %c0_8] : memref<128x128xbf16, #tpu.memory_space<vmem>>, vector<128x128xbf16>
    %cst_9 = arith.constant dense<0.000000e+00> : vector<64x128xf32>
    %14 = tpu.matmul %12, %13, %cst_9 {dimension_numbers = #tpu.dot_dimension_numbers<[1], [0], [0], [1], [0, 0, 1, 1], [], []>} : vector<64x128xbf16>, vector<128x128xbf16>, vector<64x128xf32> -> vector<64x128xf32>
    %15 = vector.shape_cast %14 : vector<64x128xf32> to vector<8x8x128xf32>
    %16 = arith.truncf %15 : vector<8x8x128xf32> to vector<8x8x128xbf16>
    %c0_10 = arith.constant 0 : index
    %c0_11 = arith.constant 0 : index
    %c0_12 = arith.constant 0 : index
    %c0_13 = arith.constant 0 : index
    %17 = vector.load %arg6[%c0_10, %c0_11, %c0_12, %c0_13] : memref<1x8x8x128xbf16, #tpu.memory_space<vmem>>, vector<1x8x8x128xbf16>
    %18 = vector.shape_cast %17 : vector<1x8x8x128xbf16> to vector<8x8x128xbf16>
    %19 = vector.shape_cast %16 : vector<8x8x128xbf16> to vector<1x8x8x128xbf16>
    tpu.vector_store %arg6[%c0_10, %c0_11, %c0_12, %c0_13], %19 {strides = array<i32>} : memref<1x8x8x128xbf16, #tpu.memory_space<vmem>>, vector<1x8x8x128xbf16>,
    %cst_14 = arith.constant dense<0.000000e+00> : vector<128xf32>
    %20 = vector.multi_reduction <add>, %14, %cst_14 [0] : vector<64x128xf32> to vector<128xf32>
    %21 = vector.shape_cast %20 : vector<128xf32> to vector<1x128xf32>
    %22 = arith.mulf %14, %14 : vector<64x128xf32>
    %cst_15 = arith.constant dense<0.000000e+00> : vector<128xf32>
    %23 = vector.multi_reduction <add>, %22, %cst_15 [0] : vector<64x128xf32> to vector<128xf32>
    %24 = vector.shape_cast %23 : vector<128xf32> to vector<1x128xf32>
    %25 = tpu.concatenate %21, %24 in 0 : vector<1x128xf32>, vector<1x128xf32> -> vector<2x128xf32>
    %c0_16 = arith.constant 0 : index
    %c0_17 = arith.constant 0 : index
    %c0_18 = arith.constant 0 : index
    %c0_19 = arith.constant 0 : index
    %26 = vector.load %arg7[%c0_16, %c0_17, %c0_18, %c0_19] : memref<1x1x2x128xf32, #tpu.memory_space<vmem>>, vector<1x1x2x128xf32>
    %27 = vector.shape_cast %26 : vector<1x1x2x128xf32> to vector<2x128xf32>
    %28 = vector.shape_cast %25 : vector<2x128xf32> to vector<1x1x2x128xf32>
    tpu.vector_store %arg7[%c0_16, %c0_17, %c0_18, %c0_19], %28 {strides = array<i32>} : memref<1x1x2x128xf32, #tpu.memory_space<vmem>>, vector<1x1x2x128xf32>,
    return
  }
  func.func @transform_0(%arg0: i32, %arg1: i32) -> (i32, i32, i32, i32) {
    %c0_i32 = arith.constant 0 : i32
    %c0_i32_0 = arith.constant 0 : i32
    %c0_i32_1 = arith.constant 0 : i32
    return %arg0, %arg1, %c0_i32, %c0_i32_0 : i32, i32, i32, i32
  }
  func.func @transform_1(%arg0: i32, %arg1: i32) -> (i32, i32) {
    %c0_i32 = arith.constant 0 : i32
    %c0_i32_0 = arith.constant 0 : i32
    %c0_i32_1 = arith.constant 0 : i32
    return %c0_i32, %c0_i32_0 : i32, i32
  }
  func.func @transform_2(%arg0: i32, %arg1: i32) -> (i32, i32) {
    %c0_i32 = arith.constant 0 : i32
    %c0_i32_0 = arith.constant 0 : i32
    %c0_i32_1 = arith.constant 0 : i32
    return %c0_i32, %c0_i32_0 : i32, i32
  }
  func.func @transform_3(%arg0: i32, %arg1: i32) -> (i32, i32) {
    %c0_i32 = arith.constant 0 : i32
    %c0_i32_0 = arith.constant 0 : i32
    %c0_i32_1 = arith.constant 0 : i32
    return %c0_i32, %c0_i32_0 : i32, i32
  }
  func.func @transform_4(%arg0: i32, %arg1: i32) -> (i32, i32, i32, i32) {
    %c0_i32 = arith.constant 0 : i32
    %c0_i32_0 = arith.constant 0 : i32
    %c0_i32_1 = arith.constant 0 : i32
    return %arg0, %arg1, %c0_i32, %c0_i32_0 : i32, i32, i32, i32
  }
  func.func @transform_5(%arg0: i32, %arg1: i32) -> (i32, i32, i32, i32) {
    %c0_i32 = arith.constant 0 : i32
    %c0_i32_0 = arith.constant 0 : i32
    %c0_i32_1 = arith.constant 0 : i32
    return %arg0, %arg1, %c0_i32, %c0_i32_0 : i32, i32, i32, i32
  }
}

module attributes {stable_mosaic.version = 11 : i64} {
  func.func @_residual_kernel(%arg0: i32, %arg1: memref<128x128xbf16, #tpu.memory_space<vmem>>, %arg2: memref<128x128xbf16, #tpu.memory_space<vmem>>, %arg3: memref<1x128xf32, #tpu.memory_space<vmem>>, %arg4: memref<1x128xf32, #tpu.memory_space<vmem>>, %arg5: memref<1x128xf32, #tpu.memory_space<vmem>>, %arg6: memref<1x128xf32, #tpu.memory_space<vmem>>, %arg7: memref<128x128xbf16, #tpu.memory_space<vmem>>) attributes {dimension_semantics = [#tpu.dimension_semantics<parallel>], iteration_bounds = array<i64: 1>, scalar_prefetch = 0 : i64, scratch_operands = 0 : i64, tpu.core_type = #tpu.core_type<tc>, window_params = [{transform_indices = @transform_0, window_bounds = array<i64: 128, 128>}, {transform_indices = @transform_1, window_bounds = array<i64: 128, 128>}, {pipeline_mode = #tpu.pipeline_mode<synchronous>, transform_indices = @transform_2, window_bounds = array<i64: 1, 128>}, {pipeline_mode = #tpu.pipeline_mode<synchronous>, transform_indices = @transform_3, window_bounds = array<i64: 1, 128>}, {pipeline_mode = #tpu.pipeline_mode<synchronous>, transform_indices = @transform_4, window_bounds = array<i64: 1, 128>}, {pipeline_mode = #tpu.pipeline_mode<synchronous>, transform_indices = @transform_5, window_bounds = array<i64: 1, 128>}, {transform_indices = @transform_6, window_bounds = array<i64: 128, 128>}]} {
    %c0 = arith.constant 0 : index
    %c0_0 = arith.constant 0 : index
    %0 = vector.load %arg1[%c0, %c0_0] : memref<128x128xbf16, #tpu.memory_space<vmem>>, vector<128x128xbf16>
    %1 = arith.extf %0 : vector<128x128xbf16> to vector<128x128xf32>
    %c0_1 = arith.constant 0 : index
    %c0_2 = arith.constant 0 : index
    %2 = vector.load %arg2[%c0_1, %c0_2] : memref<128x128xbf16, #tpu.memory_space<vmem>>, vector<128x128xbf16>
    %3 = arith.extf %2 : vector<128x128xbf16> to vector<128x128xf32>
    %c0_3 = arith.constant 0 : index
    %c0_4 = arith.constant 0 : index
    %4 = vector.load %arg3[%c0_3, %c0_4] : memref<1x128xf32, #tpu.memory_space<vmem>>, vector<1x128xf32>
    %5 = vector.broadcast %4 : vector<1x128xf32> to vector<128x128xf32>
    %6 = arith.mulf %1, %5 : vector<128x128xf32>
    %c0_5 = arith.constant 0 : index
    %c0_6 = arith.constant 0 : index
    %7 = vector.load %arg4[%c0_5, %c0_6] : memref<1x128xf32, #tpu.memory_space<vmem>>, vector<1x128xf32>
    %8 = vector.broadcast %7 : vector<1x128xf32> to vector<128x128xf32>
    %9 = arith.addf %6, %8 : vector<128x128xf32>
    %c0_7 = arith.constant 0 : index
    %c0_8 = arith.constant 0 : index
    %10 = vector.load %arg5[%c0_7, %c0_8] : memref<1x128xf32, #tpu.memory_space<vmem>>, vector<1x128xf32>
    %11 = vector.broadcast %10 : vector<1x128xf32> to vector<128x128xf32>
    %12 = arith.mulf %3, %11 : vector<128x128xf32>
    %13 = arith.addf %9, %12 : vector<128x128xf32>
    %c0_9 = arith.constant 0 : index
    %c0_10 = arith.constant 0 : index
    %14 = vector.load %arg6[%c0_9, %c0_10] : memref<1x128xf32, #tpu.memory_space<vmem>>, vector<1x128xf32>
    %15 = vector.broadcast %14 : vector<1x128xf32> to vector<128x128xf32>
    %16 = arith.addf %13, %15 : vector<128x128xf32>
    %cst = arith.constant 0.000000e+00 : f32
    %17 = vector.broadcast %cst : f32 to vector<128x128xf32>
    %18 = arith.maximumf %16, %17 : vector<128x128xf32>
    %19 = arith.truncf %18 : vector<128x128xf32> to vector<128x128xbf16>
    %c0_11 = arith.constant 0 : index
    %c0_12 = arith.constant 0 : index
    %20 = vector.load %arg7[%c0_11, %c0_12] : memref<128x128xbf16, #tpu.memory_space<vmem>>, vector<128x128xbf16>
    tpu.vector_store %arg7[%c0_11, %c0_12], %19 {strides = array<i32>} : memref<128x128xbf16, #tpu.memory_space<vmem>>, vector<128x128xbf16>,
    return
  }
  func.func @transform_0(%arg0: i32) -> (i32, i32) {
    %c0_i32 = arith.constant 0 : i32
    %c0_i32_0 = arith.constant 0 : i32
    return %arg0, %c0_i32 : i32, i32
  }
  func.func @transform_1(%arg0: i32) -> (i32, i32) {
    %c0_i32 = arith.constant 0 : i32
    %c0_i32_0 = arith.constant 0 : i32
    return %arg0, %c0_i32 : i32, i32
  }
  func.func @transform_2(%arg0: i32) -> (i32, i32) {
    %c0_i32 = arith.constant 0 : i32
    %c0_i32_0 = arith.constant 0 : i32
    %c0_i32_1 = arith.constant 0 : i32
    return %c0_i32, %c0_i32_0 : i32, i32
  }
  func.func @transform_3(%arg0: i32) -> (i32, i32) {
    %c0_i32 = arith.constant 0 : i32
    %c0_i32_0 = arith.constant 0 : i32
    %c0_i32_1 = arith.constant 0 : i32
    return %c0_i32, %c0_i32_0 : i32, i32
  }
  func.func @transform_4(%arg0: i32) -> (i32, i32) {
    %c0_i32 = arith.constant 0 : i32
    %c0_i32_0 = arith.constant 0 : i32
    %c0_i32_1 = arith.constant 0 : i32
    return %c0_i32, %c0_i32_0 : i32, i32
  }
  func.func @transform_5(%arg0: i32) -> (i32, i32) {
    %c0_i32 = arith.constant 0 : i32
    %c0_i32_0 = arith.constant 0 : i32
    %c0_i32_1 = arith.constant 0 : i32
    return %c0_i32, %c0_i32_0 : i32, i32
  }
  func.func @transform_6(%arg0: i32) -> (i32, i32) {
    %c0_i32 = arith.constant 0 : i32
    %c0_i32_0 = arith.constant 0 : i32
    return %arg0, %c0_i32 : i32, i32
  }
}

</mosaic_0001>

<bundles_post_ra>
// kernel: bottleneck_forward.8
= control target key start
LH: loop header
LB: loop body
LE: loop exit
PB: predicated region body
PF: predicated region fallthrough
CT: control target
= control target key end

     0   :  { %s753_s12 = smov 0   ;;  %s755_s13 = smov 0   ;;  %s827_s0 = inlined_call_operand.vmem [shape: bf16[2,8,8,128], index: 0, kind: input, shape index: {}]   ;;  %s828_s1 = inlined_call_operand.vmem [shape: bf16[128,128], index: 1, kind: input, shape index: {}]   ;;  %s829_s2 = inlined_call_operand.vmem [shape: bf16[2,8,8,128], index: 2, kind: output, shape index: {0}]   ;;  %s830_s3 = inlined_call_operand.vmem [shape: f32[2,1,2,128], index: 3, kind: output, shape index: {1}]  }
   0x1   :  { %s757_s14 = smov 0  }
   0x2 LB: > { %s26_s15 = sadd.s32 1, %s727_s13  ;;  %p576_p0 = scmp.ge.s32.totalorder %s731_s14, 1  ;;  %s731_s14 = sphi %s757_s14, %s14_s14   ;;  %s727_s13 = sphi %s755_s13, %s832_s13   ;;  %s723_s12 = sphi %s753_s12, %s831_s12  }
   0x3   : > { %p28_p1 = scmp.ge.s32.totalorder %s26_s15, 2  ;;  %p163_p2 = scmp.lt.s32.totalorder %s731_s14, 3 }
   0x5   : > { %s834_s15 = smov (%p28_p1, %s26_s15), 0  ;;  %p164_p3 = pnand %p576_p0, %p163_p2 }
   0x6   : > { %p203_p4 = scmp.lt.s32.totalorder (!%p164_p3), %s723_s12, 1 }
   0x7   : > { %167 = sbr.rel (%p164_p3) target bundleno = 274 (0x112), region = 28 }
   0xc   : > { %v697_v0 = vld [vmem:[%s828_s1 + $0x38] sm:$0xff]   ;;  %v698_v1 = vld [vmem:[%s828_s1 + $0x30] sm:$0xff]   ;;  %s836_s12 = smov (!%p203_p4, %s723_s12), 1  ;;  %v699_v2 = vld [vmem:[%s828_s1 + $0x28] sm:$0xff]   ;;  %vm441_vm0 = vcmask 1040384  }
   0xd   : > { %633 = vmatprep.subr.bf16.mxu0 %v697_v0  ;;  %657 = vmatprep.subr.bf16.mxu1 %v697_v0  ;;  %s596_s22 = sshll.u32 %s836_s12, 5  ;;  %v700_v3 = vld [vmem:[%s828_s1 + $0x20] sm:$0xff]   ;;  %v701_v6 = vld [vmem:[%s828_s1 + $0x18] sm:$0xff]   ;;  %v702_v7 = vld [vmem:[%s828_s1 + $0x10] sm:$0xff]   ;;  %s581_s16 = sshll.u32 %s836_s12, 1 }
   0xe   : > { %634 = vmatpush3.bf16.msra.mxu0 %v697_v0  ;;  %665 = vmatpush3.bf16.msra.mxu1 %v697_v0  ;;  %s788_s25 = scalar_lea.vmem %s827_s0, %s596_s22  ;;  %v703_v8 = vld [vmem:[%s828_s1 + $0x8] sm:$0xff]   ;;  %v704_v9 = vld [vmem:[%s828_s1] sm:$0xff]   ;;  %s220_s11 = scalar_lea.vmem %s829_s2, %s596_s22 }
   0xf   : > { %635 = vmatprep.subr.bf16.mxu0 %v698_v1  ;;  %658 = vmatprep.subr.bf16.mxu1 %v698_v1  ;;  %v705_v4 = vld [vmem:[%s788_s25] sm:$0xff]   ;;  %v707_v5 = vld [vmem:[%s788_s25 + $0x10] sm:$0xff]   ;;  %v706_v10 = vld [vmem:[%s788_s25 + $0x8] sm:$0xff]   ;;  %s228_s19 = scalar_lea.vmem %s830_s3, %s581_s16 }
  0x10   : > { %649 = vmatprep.mubr.bf16.mxu0 %v705_v4  ;;  %653 = vmatprep.mubr.bf16.mxu1 %v707_v5  ;;  %v708_v11 = vld [vmem:[%s788_s25 + $0x18] sm:$0xff]  }
  0x12   : > { %636 = vmatpush3.bf16.msra.mxu0 %v698_v1  ;;  %666 = vmatpush3.bf16.msra.mxu1 %v698_v1 }
  0x13   : > { %637 = vmatprep.subr.bf16.mxu0 %v699_v2  ;;  %659 = vmatprep.subr.bf16.mxu1 %v699_v2 }
  0x16   : > { %638 = vmatpush3.bf16.msra.mxu0 %v699_v2  ;;  %667 = vmatpush3.bf16.msra.mxu1 %v699_v2 }
  0x17   : > { %639 = vmatprep.subr.bf16.mxu0 %v700_v3  ;;  %660 = vmatprep.subr.bf16.mxu1 %v700_v3 }
  0x1a   : > { %640 = vmatpush3.bf16.msra.mxu0 %v700_v3  ;;  %668 = vmatpush3.bf16.msra.mxu1 %v700_v3 }
  0x1b   : > { %641 = vmatprep.subr.bf16.mxu0 %v701_v6  ;;  %661 = vmatprep.subr.bf16.mxu1 %v701_v6 }
  0x1e   : > { %642 = vmatpush3.bf16.msra.mxu0 %v701_v6  ;;  %669 = vmatpush3.bf16.msra.mxu1 %v701_v6 }
  0x1f   : > { %643 = vmatprep.subr.bf16.mxu0 %v702_v7  ;;  %662 = vmatprep.subr.bf16.mxu1 %v702_v7 }
  0x22   : > { %644 = vmatpush3.bf16.msra.mxu0 %v702_v7  ;;  %670 = vmatpush3.bf16.msra.mxu1 %v702_v7 }
  0x23   : > { %645 = vmatprep.subr.bf16.mxu0 %v703_v8  ;;  %663 = vmatprep.subr.bf16.mxu1 %v703_v8 }
  0x26   : > { %646 = vmatpush3.bf16.msra.mxu0 %v703_v8  ;;  %671 = vmatpush3.bf16.msra.mxu1 %v703_v8 }
  0x27   : > { %647 = vmatprep.subr.bf16.mxu0 %v704_v9  ;;  %664 = vmatprep.subr.bf16.mxu1 %v704_v9 }
  0x2a   : > { %648 = vmatpush3.bf16.msra.mxu0 %v704_v9  ;;  %672 = vmatpush3.bf16.msra.mxu1 %v704_v9 }
  0x2d   : > { %650 = vmatmul.mubr.bf16.vlgmr.msra.gmra.mxu0 %v706_v10  ;;  %654 = vmatmul.mubr.bf16.vlgmr.msra.gmra.mxu1 %v708_v11 }
  0xed   : > { %v651_v12 = vpop.f32.mrf.mxu0  ;;  %v655_v13 = vpop.f32.mrf.mxu1 }
  0xee   : > { %v422_v27 = vmul.f32 %v651_v12, %v651_v12  ;;  %v426_v39 = vmul.f32 %v655_v13, %v655_v13 }
  0xef   : > { %v360_v14 = vpop.f32.mrf.mxu0  ;;  %v376_v15 = vpop.f32.mrf.mxu1 }
  0xf0   : > { %v420_v20 = vmul.f32 %v360_v14, %v360_v14  ;;  %v424_v33 = vmul.f32 %v376_v15, %v376_v15 }
  0xf1   : > { %v652_v16 = vpop.f32.mrf.mxu0  ;;  %v656_v17 = vpop.f32.mrf.mxu1 }
  0xf2   : > { %v606_v18 = vpack.c.bf16 %v652_v16, %v651_v12  ;;  %v616_v19 = vpack.c.bf16 %v656_v17, %v655_v13  ;;  %v423_v30 = vmul.f32 %v652_v16, %v652_v16  ;;  %v427_v42 = vmul.f32 %v656_v17, %v656_v17 }
  0xf3   : > { %v363_v21 = vpop.f32.mrf.mxu0  ;;  %v379_v22 = vpop.f32.mrf.mxu1 }
  0xf4   : > { %618 = vst [vmem:[%s220_s11 + $0x8] sm:$0xff] %v606_v18   ;;  %v601_v23 = vpack.c.bf16 %v363_v21, %v360_v14  ;;  %v407_v24 = vadd.f32 %v363_v21, %v360_v14  ;;  %v421_v25 = vmul.f32 %v363_v21, %v363_v21  ;;  %620 = vst [vmem:[%s220_s11 + $0x18] sm:$0xff] %v616_v19  }
  0xf5   : > { %v611_v26 = vpack.c.bf16 %v379_v22, %v376_v15  ;;  %v425_v37 = vmul.f32 %v379_v22, %v379_v22 }
  0xf6   : > { %602 = vst [vmem:[%s220_s11] sm:$0xff] %v601_v23   ;;  %v408_v28 = vadd.f32 %v651_v12, %v407_v24  ;;  %v428_v29 = vadd.f32 %v421_v25, %v420_v20 }
  0xf7   : > { %619 = vst [vmem:[%s220_s11 + $0x10] sm:$0xff] %v611_v26  }
  0xf8   : > { %v429_v31 = vadd.f32 %v428_v29, %v422_v27  ;;  %v409_v32 = vadd.f32 %v652_v16, %v408_v28 }
  0xfa   : > { %v410_v34 = vadd.f32 %v409_v32, %v376_v15  ;;  %v430_v35 = vadd.f32 %v429_v31, %v423_v30 }
  0xfc   : > { %v411_v36 = vadd.f32 %v410_v34, %v379_v22  ;;  %v431_v38 = vadd.f32 %v430_v35, %v424_v33 }
  0xfe   : > { %v412_v40 = vadd.f32 %v655_v13, %v411_v36  ;;  %v432_v41 = vadd.f32 %v431_v38, %v425_v37 }
 0x100   : > { %v413_v43 = vadd.f32 %v656_v17, %v412_v40  ;;  %v433_v44 = vadd.f32 %v432_v41, %v426_v39 }
 0x102   : > { %v414_v45 = vrot.slane %v413_v43, 4  ;;  %v434_v46 = vadd.f32 %v433_v44, %v427_v42 }
 0x104   : > { %v415_v47 = vadd.f32 %v414_v45, %v413_v43  ;;  %v435_v48 = vrot.slane %v434_v46, 4 }
 0x106   : > { %v416_v49 = vrot.slane %v415_v47, 2  ;;  %v436_v50 = vadd.f32 %v435_v48, %v434_v46 }
 0x108   : > { %v417_v51 = vadd.f32 %v416_v49, %v415_v47  ;;  %v437_v52 = vrot.slane %v436_v50, 2 }
 0x10a   : > { %v418_v53 = vrot.slane %v417_v51, 1  ;;  %v438_v54 = vadd.f32 %v437_v52, %v436_v50 }
 0x10c   : > { %v439_v55 = vrot.slane %v438_v54, 1  ;;  %v419_v56 = vadd.f32 %v418_v53, %v417_v51 }
 0x10e   : > { %v440_v57 = vadd.f32 %v439_v55, %v438_v54 }
 0x110   : > { %v442_v58 = vsel %vm441_vm0, %v419_v56, %v440_v57 }
 0x111   : > { %443 = vst [vmem:[%s228_s19] sm:$0x3] %v442_v58 }
 0x112 PF: > { %s14_s14 = sadd.s32 1, %s731_s14   ;;  %s831_s12 = smov %s727_s13 }
 0x113   : > { %p11_p5 = scmp.ge.s32.totalorder %s14_s14, 4   ;;  %s832_s13 = smov %s834_s15 }
 0x115   :  { %13 = sbr.rel (!%p11_p5) target bundleno = 2 (0x2), region = 70 }

// kernel: bottleneck_forward.5
= control target key start
LH: loop header
LB: loop body
LE: loop exit
PB: predicated region body
PF: predicated region fallthrough
CT: control target
= control target key end

     0   :  { %s1371_s12 = smov 0   ;;  %s1373_s13 = smov 0   ;;  %s1565_s0 = inlined_call_operand.vmem [shape: bf16[2,16,16,128], index: 0, kind: input, shape index: {}]   ;;  %s1566_s1 = inlined_call_operand.vmem [shape: bf16[128,128], index: 1, kind: input, shape index: {}]   ;;  %s1567_s2 = inlined_call_operand.vmem [shape: bf16[2,16,16,128], index: 2, kind: output, shape index: {0}]   ;;  %s1568_s3 = inlined_call_operand.vmem [shape: f32[2,1,2,128], index: 3, kind: output, shape index: {1}]  }
   0x1   :  { %s1375_s14 = smov 0  }
   0x2 LB: > { %s26_s15 = sadd.s32 1, %s1345_s13  ;;  %p998_p0 = scmp.ge.s32.totalorder %s1349_s14, 1  ;;  %s1349_s14 = sphi %s1375_s14, %s14_s14   ;;  %s1345_s13 = sphi %s1373_s13, %s1570_s13   ;;  %s1341_s12 = sphi %s1371_s12, %s1569_s12  }
   0x3   : > { %p28_p1 = scmp.ge.s32.totalorder %s26_s15, 2  ;;  %p164_p2 = scmp.lt.s32.totalorder %s1349_s14, 3 }
   0x5   : > { %s1572_s15 = smov (%p28_p1, %s26_s15), 0  ;;  %p165_p3 = pnand %p998_p0, %p164_p2 }
   0x6   : > { %p206_p4 = scmp.lt.s32.totalorder (!%p165_p3), %s1341_s12, 1 }
   0x7   : > { %168 = sbr.rel (%p165_p3) target bundleno = 322 (0x142), region = 28 }
   0xc   : > { %v1303_v0 = vld [vmem:[%s1566_s1 + $0x38] sm:$0xff]   ;;  %v1304_v1 = vld [vmem:[%s1566_s1 + $0x30] sm:$0xff]   ;;  %s1574_s12 = smov (!%p206_p4, %s1341_s12), 1  ;;  %v1305_v2 = vld [vmem:[%s1566_s1 + $0x28] sm:$0xff]   ;;  %vm854_vm0 = vcmask 1040384  }
   0xd   : > { %1215 = vmatprep.subr.bf16.mxu0 %v1303_v0  ;;  %1263 = vmatprep.subr.bf16.mxu1 %v1303_v0  ;;  %s1062_s22 = sshll.u32 %s1574_s12, 7  ;;  %v1306_v3 = vld [vmem:[%s1566_s1 + $0x20] sm:$0xff]   ;;  %v1307_v5 = vld [vmem:[%s1566_s1 + $0x18] sm:$0xff]   ;;  %v1308_v6 = vld [vmem:[%s1566_s1 + $0x10] sm:$0xff]   ;;  %s1003_s16 = sshll.u32 %s1574_s12, 1 }
   0xe   : > { %1216 = vmatpush3.bf16.msra.mxu0 %v1303_v0  ;;  %1271 = vmatpush3.bf16.msra.mxu1 %v1303_v0  ;;  %s1406_s25 = scalar_lea.vmem %s1565_s0, %s1062_s22  ;;  %v1309_v8 = vld [vmem:[%s1566_s1 + $0x8] sm:$0xff]   ;;  %v1310_v9 = vld [vmem:[%s1566_s1] sm:$0xff]   ;;  %s1448_s11 = scalar_lea.vmem %s1567_s2, %s1062_s22 }
   0xf   : > { %1217 = vmatprep.subr.bf16.mxu0 %v1304_v1  ;;  %1264 = vmatprep.subr.bf16.mxu1 %v1304_v1  ;;  %v1311_v4 = vld [vmem:[%s1406_s25] sm:$0xff]   ;;  %v1312_v10 = vld [vmem:[%s1406_s25 + $0x8] sm:$0xff]   ;;  %v1313_v12 = vld [vmem:[%s1406_s25 + $0x10] sm:$0xff]   ;;  %s233_s19 = scalar_lea.vmem %s1568_s3, %s1003_s16 }
  0x10   : > { %1231 = vmatprep.mubr.bf16.mxu0 %v1311_v4  ;;  %v1319_v7 = vld [vmem:[%s1406_s25 + $0x40] sm:$0xff]   ;;  %v1320_v11 = vld [vmem:[%s1406_s25 + $0x48] sm:$0xff]   ;;  %v1321_v13 = vld [vmem:[%s1406_s25 + $0x50] sm:$0xff]  }
  0x11   : > { %1247 = vmatprep.mubr.bf16.mxu1 %v1319_v7  ;;  %v1314_v14 = vld [vmem:[%s1406_s25 + $0x18] sm:$0xff]   ;;  %v1315_v16 = vld [vmem:[%s1406_s25 + $0x20] sm:$0xff]   ;;  %v1316_v18 = vld [vmem:[%s1406_s25 + $0x28] sm:$0xff]  }
  0x12   : > { %1218 = vmatpush3.bf16.msra.mxu0 %v1304_v1  ;;  %1272 = vmatpush3.bf16.msra.mxu1 %v1304_v1  ;;  %v1322_v15 = vld [vmem:[%s1406_s25 + $0x58] sm:$0xff]   ;;  %v1323_v17 = vld [vmem:[%s1406_s25 + $0x60] sm:$0xff]   ;;  %v1324_v19 = vld [vmem:[%s1406_s25 + $0x68] sm:$0xff]  }
  0x13   : > { %1219 = vmatprep.subr.bf16.mxu0 %v1305_v2  ;;  %1265 = vmatprep.subr.bf16.mxu1 %v1305_v2  ;;  %v1317_v20 = vld [vmem:[%s1406_s25 + $0x30] sm:$0xff]   ;;  %v1318_v22 = vld [vmem:[%s1406_s25 + $0x38] sm:$0xff]  }
  0x14   : > { %v1325_v21 = vld [vmem:[%s1406_s25 + $0x70] sm:$0xff]   ;;  %v1326_v23 = vld [vmem:[%s1406_s25 + $0x78] sm:$0xff]  }
  0x16   : > { %1220 = vmatpush3.bf16.msra.mxu0 %v1305_v2  ;;  %1273 = vmatpush3.bf16.msra.mxu1 %v1305_v2 }
  0x17   : > { %1221 = vmatprep.subr.bf16.mxu0 %v1306_v3  ;;  %1266 = vmatprep.subr.bf16.mxu1 %v1306_v3 }
  0x1a   : > { %1222 = vmatpush3.bf16.msra.mxu0 %v1306_v3  ;;  %1274 = vmatpush3.bf16.msra.mxu1 %v1306_v3 }
  0x1b   : > { %1223 = vmatprep.subr.bf16.mxu0 %v1307_v5  ;;  %1267 = vmatprep.subr.bf16.mxu1 %v1307_v5 }
  0x1e   : > { %1224 = vmatpush3.bf16.msra.mxu0 %v1307_v5  ;;  %1275 = vmatpush3.bf16.msra.mxu1 %v1307_v5 }
  0x1f   : > { %1225 = vmatprep.subr.bf16.mxu0 %v1308_v6  ;;  %1268 = vmatprep.subr.bf16.mxu1 %v1308_v6 }
  0x22   : > { %1226 = vmatpush3.bf16.msra.mxu0 %v1308_v6  ;;  %1276 = vmatpush3.bf16.msra.mxu1 %v1308_v6 }
  0x23   : > { %1227 = vmatprep.subr.bf16.mxu0 %v1309_v8  ;;  %1269 = vmatprep.subr.bf16.mxu1 %v1309_v8 }
  0x26   : > { %1228 = vmatpush3.bf16.msra.mxu0 %v1309_v8  ;;  %1277 = vmatpush3.bf16.msra.mxu1 %v1309_v8 }
  0x27   : > { %1229 = vmatprep.subr.bf16.mxu0 %v1310_v9  ;;  %1270 = vmatprep.subr.bf16.mxu1 %v1310_v9 }
  0x2a   : > { %1230 = vmatpush3.bf16.msra.mxu0 %v1310_v9  ;;  %1278 = vmatpush3.bf16.msra.mxu1 %v1310_v9 }
  0x2d   : > { %1232 = vmatmul.mubr.bf16.vlgmr.msra.gmra.mxu0 %v1312_v10  ;;  %1248 = vmatmul.mubr.bf16.vlgmr.msra.gmra.mxu1 %v1320_v11 }
  0x2e   : > { %1235 = vmatprep.mubr.bf16.mxu0 %v1313_v12  ;;  %1251 = vmatprep.mubr.bf16.mxu1 %v1321_v13 }
  0x35   : > { %1236 = vmatmul.mubr.bf16.gmra.mxu0 %v1314_v14  ;;  %1252 = vmatmul.mubr.bf16.gmra.mxu1 %v1322_v15 }
  0x36   : > { %1239 = vmatprep.mubr.bf16.mxu0 %v1315_v16  ;;  %1255 = vmatprep.mubr.bf16.mxu1 %v1323_v17 }
  0x3d   : > { %1240 = vmatmul.mubr.bf16.gmra.mxu0 %v1316_v18  ;;  %1256 = vmatmul.mubr.bf16.gmra.mxu1 %v1324_v19 }
  0x3e   : > { %1243 = vmatprep.mubr.bf16.mxu0 %v1317_v20  ;;  %1259 = vmatprep.mubr.bf16.mxu1 %v1325_v21 }
  0x45   : > { %1244 = vmatmul.mubr.bf16.gmra.mxu0 %v1318_v22  ;;  %1260 = vmatmul.mubr.bf16.gmra.mxu1 %v1326_v23 }
  0xed   : > { %v1233_v24 = vpop.f32.mrf.mxu0  ;;  %v1439_v25 = vpop.f32.mrf.mxu1 }
  0xee   : > { %v787_v41 = vmul.f32 %v1233_v24, %v1233_v24 }
  0xef   : > { %v461_v26 = vpop.f32.mrf.mxu0  ;;  %v1441_v27 = vpop.f32.mrf.mxu1 }
  0xf0   : > { %v785_v32 = vmul.f32 %v461_v26, %v461_v26 }
  0xf1   : > { %v1234_v28 = vpop.f32.mrf.mxu0  ;;  %v1450_v29 = vpop.f32.mrf.mxu1 }
  0xf2   : > { %v1104_v30 = vpack.c.bf16 %v1234_v28, %v1233_v24  ;;  %v1144_v31 = vpack.c.bf16 %v1450_v29, %v1439_v25  ;;  %v788_v46 = vmul.f32 %v1234_v28, %v1234_v28 }
  0xf3   : > { %v464_v33 = vpop.f32.mrf.mxu0  ;;  %v1454_v34 = vpop.f32.mrf.mxu1 }
  0xf4   : > { %1176 = vst [vmem:[%s1448_s11 + $0x8] sm:$0xff] %v1104_v30   ;;  %v1099_v35 = vpack.c.bf16 %v464_v33, %v461_v26  ;;  %v748_v36 = vadd.f32 %v464_v33, %v461_v26  ;;  %v786_v37 = vmul.f32 %v464_v33, %v464_v33  ;;  %1184 = vst [vmem:[%s1448_s11 + $0x48] sm:$0xff] %v1144_v31  }
  0xf5   : > { %v1139_v38 = vpack.c.bf16 %v1454_v34, %v1441_v27  ;;  %v1237_v39 = vpop.f32.mrf.mxu0  ;;  %v1460_v40 = vpop.f32.mrf.mxu1 }
  0xf6   : > { %1100 = vst [vmem:[%s1448_s11] sm:$0xff] %v1099_v35   ;;  %v749_v42 = vadd.f32 %v1233_v24, %v748_v36  ;;  %v817_v43 = vadd.f32 %v786_v37, %v785_v32  ;;  %v791_v1 = vmul.f32 %v1237_v39, %v1237_v39 }
  0xf7   : > { %1183 = vst [vmem:[%s1448_s11 + $0x40] sm:$0xff] %v1139_v38   ;;  %v477_v44 = vpop.f32.mrf.mxu0  ;;  %v1464_v45 = vpop.f32.mrf.mxu1 }
  0xf8   : > { %v818_v47 = vadd.f32 %v817_v43, %v787_v41  ;;  %v750_v48 = vadd.f32 %v1234_v28, %v749_v42  ;;  %v789_v52 = vmul.f32 %v477_v44, %v477_v44 }
  0xf9   : > { %v1238_v49 = vpop.f32.mrf.mxu0  ;;  %v1466_v50 = vpop.f32.mrf.mxu1 }
  0xfa   : > { %v751_v51 = vadd.f32 %v750_v48, %v477_v44  ;;  %v819_v53 = vadd.f32 %v818_v47, %v788_v46  ;;  %v1114_v54 = vpack.c.bf16 %v1238_v49, %v1237_v39  ;;  %v1154_v56 = vpack.c.bf16 %v1466_v50, %v1460_v40 }
  0xfb   : > { %v480_v55 = vpop.f32.mrf.mxu0  ;;  %v1470_v57 = vpop.f32.mrf.mxu1  ;;  %v792_v6 = vmul.f32 %v1238_v49, %v1238_v49 }
  0xfc   : > { %v820_v58 = vadd.f32 %v819_v53, %v789_v52  ;;  %1178 = vst [vmem:[%s1448_s11 + $0x18] sm:$0xff] %v1114_v54   ;;  %v1109_v59 = vpack.c.bf16 %v480_v55, %v477_v44  ;;  %v752_v60 = vadd.f32 %v751_v51, %v480_v55  ;;  %v790_v61 = vmul.f32 %v480_v55, %v480_v55 }
  0xfd   : > { %v1241_v62 = vpop.f32.mrf.mxu0  ;;  %1186 = vst [vmem:[%s1448_s11 + $0x58] sm:$0xff] %v1154_v56   ;;  %v1149_v63 = vpack.c.bf16 %v1470_v57, %v1464_v45  ;;  %v1476_v0 = vpop.f32.mrf.mxu1 }
  0xfe   : > { %1177 = vst [vmem:[%s1448_s11 + $0x10] sm:$0xff] %v1109_v59   ;;  %v753_v2 = vadd.f32 %v1237_v39, %v752_v60  ;;  %v821_v3 = vadd.f32 %v820_v58, %v790_v61  ;;  %v795_v26 = vmul.f32 %v1241_v62, %v1241_v62  ;;  %v801_v61 = vmul.f32 %v1441_v27, %v1441_v27 }
  0xff   : > { %v493_v4 = vpop.f32.mrf.mxu0  ;;  %1185 = vst [vmem:[%s1448_s11 + $0x50] sm:$0xff] %v1149_v63   ;;  %v1480_v5 = vpop.f32.mrf.mxu1 }
 0x100   : > { %v822_v7 = vadd.f32 %v821_v3, %v791_v1  ;;  %v754_v8 = vadd.f32 %v1238_v49, %v753_v2  ;;  %v793_v12 = vmul.f32 %v493_v4, %v493_v4  ;;  %v802_v2 = vmul.f32 %v1454_v34, %v1454_v34 }
 0x101   : > { %v1242_v9 = vpop.f32.mrf.mxu0  ;;  %v1482_v10 = vpop.f32.mrf.mxu1 }
 0x102   : > { %v755_v11 = vadd.f32 %v754_v8, %v493_v4  ;;  %v823_v13 = vadd.f32 %v822_v7, %v792_v6  ;;  %v1124_v14 = vpack.c.bf16 %v1242_v9, %v1241_v62  ;;  %v1164_v16 = vpack.c.bf16 %v1482_v10, %v1476_v0 }
 0x103   : > { %v496_v15 = vpop.f32.mrf.mxu0  ;;  %v1486_v17 = vpop.f32.mrf.mxu1  ;;  %v796_v33 = vmul.f32 %v1242_v9, %v1242_v9  ;;  %v804_v8 = vmul.f32 %v1450_v29, %v1450_v29 }
 0x104   : > { %v824_v18 = vadd.f32 %v823_v13, %v793_v12  ;;  %1180 = vst [vmem:[%s1448_s11 + $0x28] sm:$0xff] %v1124_v14   ;;  %v1119_v19 = vpack.c.bf16 %v496_v15, %v493_v4  ;;  %v756_v20 = vadd.f32 %v755_v11, %v496_v15  ;;  %v794_v21 = vmul.f32 %v496_v15, %v496_v15 }
 0x105   : > { %v1245_v22 = vpop.f32.mrf.mxu0  ;;  %1188 = vst [vmem:[%s1448_s11 + $0x68] sm:$0xff] %v1164_v16   ;;  %v1159_v23 = vpack.c.bf16 %v1486_v17, %v1480_v5  ;;  %v1492_v24 = vpop.f32.mrf.mxu1  ;;  %v803_v4 = vmul.f32 %v1439_v25, %v1439_v25  ;;  %v805_v12 = vmul.f32 %v1464_v45, %v1464_v45  ;;  %v806_v15 = vmul.f32 %v1470_v57, %v1470_v57 }
 0x106   : > { %1179 = vst [vmem:[%s1448_s11 + $0x20] sm:$0xff] %v1119_v19   ;;  %v757_v28 = vadd.f32 %v1241_v62, %v756_v20  ;;  %v825_v30 = vadd.f32 %v824_v18, %v794_v21  ;;  %v799_v54 = vmul.f32 %v1245_v22, %v1245_v22  ;;  %v809_v21 = vmul.f32 %v1480_v5, %v1480_v5 }
 0x107   : > { %v509_v31 = vpop.f32.mrf.mxu0  ;;  %1187 = vst [vmem:[%s1448_s11 + $0x60] sm:$0xff] %v1159_v23   ;;  %v1496_v32 = vpop.f32.mrf.mxu1 }
 0x108   : > { %v826_v35 = vadd.f32 %v825_v30, %v795_v26  ;;  %v758_v36 = vadd.f32 %v1242_v9, %v757_v28  ;;  %v797_v41 = vmul.f32 %v509_v31, %v509_v31  ;;  %v810_v26 = vmul.f32 %v1486_v17, %v1486_v17 }
 0x109   : > { %v1246_v37 = vpop.f32.mrf.mxu0  ;;  %v1498_v38 = vpop.f32.mrf.mxu1 }
 0x10a   : > { %v759_v39 = vadd.f32 %v758_v36, %v509_v31  ;;  %v827_v42 = vadd.f32 %v826_v35, %v796_v33  ;;  %v1134_v43 = vpack.c.bf16 %v1246_v37, %v1245_v22  ;;  %v1174_v46 = vpack.c.bf16 %v1498_v38, %v1492_v24 }
 0x10b   : > { %v512_v44 = vpop.f32.mrf.mxu0  ;;  %v576_v47 = vpop.f32.mrf.mxu1  ;;  %v800_v58 = vmul.f32 %v1246_v37, %v1246_v37  ;;  %v813_v35 = vmul.f32 %v1496_v32, %v1496_v32 }
 0x10c   : > { %v828_v48 = vadd.f32 %v827_v42, %v797_v41  ;;  %1182 = vst [vmem:[%s1448_s11 + $0x38] sm:$0xff] %v1134_v43   ;;  %v1129_v49 = vpack.c.bf16 %v512_v44, %v509_v31  ;;  %v760_v51 = vadd.f32 %v759_v39, %v512_v44  ;;  %v798_v52 = vmul.f32 %v512_v44, %v512_v44 }
 0x10d   : > { %1190 = vst [vmem:[%s1448_s11 + $0x78] sm:$0xff] %v1174_v46   ;;  %v1169_v53 = vpack.c.bf16 %v576_v47, %v1496_v32  ;;  %v814_v39 = vmul.f32 %v576_v47, %v576_v47  ;;  %v815_v41 = vmul.f32 %v1492_v24, %v1492_v24  ;;  %v816_v43 = vmul.f32 %v1498_v38, %v1498_v38 }
 0x10e   : > { %1181 = vst [vmem:[%s1448_s11 + $0x30] sm:$0xff] %v1129_v49   ;;  %v761_v55 = vadd.f32 %v1245_v22, %v760_v51  ;;  %v829_v56 = vadd.f32 %v828_v48, %v798_v52 }
 0x10f   : > { %1189 = vst [vmem:[%s1448_s11 + $0x70] sm:$0xff] %v1169_v53  }
 0x110   : > { %v762_v59 = vadd.f32 %v1246_v37, %v761_v55  ;;  %v830_v60 = vadd.f32 %v829_v56, %v799_v54 }
 0x112   : > { %v831_v62 = vadd.f32 %v830_v60, %v800_v58  ;;  %v763_v63 = vadd.f32 %v762_v59, %v1441_v27 }
 0x114   : > { %v764_v1 = vadd.f32 %v763_v63, %v1454_v34  ;;  %v832_v3 = vadd.f32 %v831_v62, %v801_v61 }
 0x116   : > { %v765_v6 = vadd.f32 %v1439_v25, %v764_v1  ;;  %v833_v7 = vadd.f32 %v832_v3, %v802_v2  ;;  %v807_v25 = vmul.f32 %v1460_v40, %v1460_v40 }
 0x118   : > { %v834_v9 = vadd.f32 %v833_v7, %v803_v4  ;;  %v766_v11 = vadd.f32 %v1450_v29, %v765_v6  ;;  %v808_v29 = vmul.f32 %v1466_v50, %v1466_v50 }
 0x11a   : > { %v767_v27 = vadd.f32 %v766_v11, %v1464_v45  ;;  %v835_v13 = vadd.f32 %v834_v9, %v804_v8 }
 0x11c   : > { %v836_v34 = vadd.f32 %v835_v13, %v805_v12  ;;  %v768_v14 = vadd.f32 %v767_v27, %v1470_v57 }
 0x11e   : > { %v769_v16 = vadd.f32 %v1460_v40, %v768_v14  ;;  %v837_v18 = vadd.f32 %v836_v34, %v806_v15  ;;  %v811_v40 = vmul.f32 %v1476_v0, %v1476_v0 }
 0x120   : > { %v838_v19 = vadd.f32 %v837_v18, %v807_v25  ;;  %v770_v20 = vadd.f32 %v1466_v50, %v769_v16  ;;  %v812_v50 = vmul.f32 %v1482_v10, %v1482_v10 }
 0x122   : > { %v771_v45 = vadd.f32 %v770_v20, %v1480_v5  ;;  %v839_v22 = vadd.f32 %v838_v19, %v808_v29 }
 0x124   : > { %v840_v23 = vadd.f32 %v839_v22, %v809_v21  ;;  %v772_v57 = vadd.f32 %v771_v45, %v1486_v17 }
 0x126   : > { %v773_v28 = vadd.f32 %v1476_v0, %v772_v57  ;;  %v841_v30 = vadd.f32 %v840_v23, %v810_v26 }
 0x128   : > { %v842_v31 = vadd.f32 %v841_v30, %v811_v40  ;;  %v774_v33 = vadd.f32 %v1482_v10, %v773_v28 }
 0x12a   : > { %v775_v5 = vadd.f32 %v774_v33, %v1496_v32  ;;  %v843_v36 = vadd.f32 %v842_v31, %v812_v50 }
 0x12c   : > { %v844_v37 = vadd.f32 %v843_v36, %v813_v35  ;;  %v776_v17 = vadd.f32 %v775_v5, %v576_v47 }
 0x12e   : > { %v777_v0 = vadd.f32 %v1492_v24, %v776_v17  ;;  %v845_v42 = vadd.f32 %v844_v37, %v814_v39 }
 0x130   : > { %v778_v10 = vadd.f32 %v1498_v38, %v777_v0  ;;  %v846_v44 = vadd.f32 %v845_v42, %v815_v41 }
 0x132   : > { %v779_v46 = vrot.slane %v778_v10, 4  ;;  %v847_v48 = vadd.f32 %v846_v44, %v816_v43 }
 0x134   : > { %v780_v32 = vadd.f32 %v779_v46, %v778_v10  ;;  %v848_v49 = vrot.slane %v847_v48, 4 }
 0x136   : > { %v781_v51 = vrot.slane %v780_v32, 2  ;;  %v849_v52 = vadd.f32 %v848_v49, %v847_v48 }
 0x138   : > { %v782_v47 = vadd.f32 %v781_v51, %v780_v32  ;;  %v850_v53 = vrot.slane %v849_v52, 2 }
 0x13a   : > { %v783_v54 = vrot.slane %v782_v47, 1  ;;  %v851_v55 = vadd.f32 %v850_v53, %v849_v52 }
 0x13c   : > { %v852_v56 = vrot.slane %v851_v55, 1  ;;  %v784_v24 = vadd.f32 %v783_v54, %v782_v47 }
 0x13e   : > { %v853_v38 = vadd.f32 %v852_v56, %v851_v55 }
 0x140   : > { %v855_v58 = vsel %vm854_vm0, %v784_v24, %v853_v38 }
 0x141   : > { %856 = vst [vmem:[%s233_s19] sm:$0x3] %v855_v58 }
 0x142 PF: > { %s14_s14 = sadd.s32 1, %s1349_s14   ;;  %s1569_s12 = smov %s1345_s13 }
 0x143   : > { %p11_p5 = scmp.ge.s32.totalorder %s14_s14, 4   ;;  %s1570_s13 = smov %s1572_s15 }
 0x145   :  { %13 = sbr.rel (!%p11_p5) target bundleno = 2 (0x2), region = 70 }

// kernel: bottleneck_forward.7
= control target key start
LH: loop header
LB: loop body
LE: loop exit
PB: predicated region body
PF: predicated region fallthrough
CT: control target
= control target key end

     0   :  { %s856_s18 = smov 0   ;;  %s858_s19 = smov 0   ;;  %s930_s0 = inlined_call_operand.vmem [shape: bf16[2,8,8,128], index: 0, kind: input, shape index: {}]   ;;  %s931_s1 = inlined_call_operand.vmem [shape: bf16[128,128], index: 1, kind: input, shape index: {}]   ;;  %s932_s2 = inlined_call_operand.vmem [shape: f32[1,128], index: 2, kind: input, shape index: {}]   ;;  %s933_s3 = inlined_call_operand.vmem [shape: f32[1,128], index: 3, kind: input, shape index: {}]   ;;  %s934_s4 = inlined_call_operand.vmem [shape: bf16[2,8,8,128], index: 4, kind: output, shape index: {0}]   ;;  %s935_s5 = inlined_call_operand.vmem [shape: f32[2,1,2,128], index: 5, kind: output, shape index: {1}]  }
   0x1   :  { %s860_s20 = smov 0  }
   0x2 LB: > { %s28_s21 = sadd.s32 1, %s820_s19  ;;  %p656_p0 = scmp.ge.s32.totalorder %s824_s20, 1  ;;  %s824_s20 = sphi %s860_s20, %s16_s20   ;;  %s820_s19 = sphi %s858_s19, %s937_s19   ;;  %s816_s18 = sphi %s856_s18, %s936_s18  }
   0x3   : > { %p30_p1 = scmp.ge.s32.totalorder %s28_s21, 2  ;;  %p213_p2 = scmp.lt.s32.totalorder %s824_s20, 3 }
   0x5   : > { %s939_s21 = smov (%p30_p1, %s28_s21), 0  ;;  %p214_p3 = pnand %p656_p0, %p213_p2 }
   0x6   : > { %p257_p4 = scmp.lt.s32.totalorder (!%p214_p3), %s816_s18, 1 }
   0x7   : > { %217 = sbr.rel (%p214_p3) target bundleno = 274 (0x112), region = 36 }
   0xc   : > { %v794_v0 = vld [vmem:[%s931_s1 + $0x38] sm:$0xff]   ;;  %v795_v1 = vld [vmem:[%s931_s1 + $0x30] sm:$0xff]   ;;  %s941_s18 = smov (!%p257_p4, %s816_s18), 1  ;;  %v796_v2 = vld [vmem:[%s931_s1 + $0x28] sm:$0xff]   ;;  %vm521_vm0 = vcmask 1040384  }
   0xd   : > { %730 = vmatprep.subr.bf16.mxu0 %v794_v0  ;;  %754 = vmatprep.subr.bf16.mxu1 %v794_v0  ;;  %s674_s28 = sshll.u32 %s941_s18, 5  ;;  %v797_v3 = vld [vmem:[%s931_s1 + $0x20] sm:$0xff]   ;;  %v798_v16 = vld [vmem:[%s931_s1 + $0x18] sm:$0xff]   ;;  %v799_v29 = vld [vmem:[%s931_s1 + $0x10] sm:$0xff]  }
   0xe   : > { %731 = vmatpush3.bf16.msra.mxu0 %v794_v0  ;;  %762 = vmatpush3.bf16.msra.mxu1 %v794_v0  ;;  %s264_s6 = scalar_lea.vmem %s930_s0, %s674_s28  ;;  %v662_v5 = vld [vmem:[%s932_s2] ss:$0 sm:$0xff]  ;;  %v800_v38 = vld [vmem:[%s931_s1 + $0x8] sm:$0xff]   ;;  %s274_s27 = scalar_lea.vmem %s934_s4, %s674_s28 }
   0xf   : > { %732 = vmatprep.subr.bf16.mxu0 %v795_v1  ;;  %755 = vmatprep.subr.bf16.mxu1 %v795_v1  ;;  %v677_v4 = vld [vmem:[%s264_s6] sm:$0xff]   ;;  %v713_v8 = vld [vmem:[%s264_s6 + $0x10] sm:$0xff]   ;;  %v712_v10 = vld [vmem:[%s264_s6 + $0x8] sm:$0xff]   ;;  %s661_s28 = sshll.u32 %s941_s18, 1 }
  0x10   : > { %v678_v6 = vunpack.c.l.bf16 %v677_v4  ;;  %v679_v7 = vunpack.c.h.bf16 %v677_v4  ;;  %v663_v9 = vld [vmem:[%s933_s3] ss:$0 sm:$0xff]  ;;  %v686_v11 = vunpack.c.l.bf16 %v713_v8  ;;  %v687_v12 = vunpack.c.h.bf16 %v713_v8  ;;  %v714_v15 = vld [vmem:[%s264_s6 + $0x18] sm:$0xff]   ;;  %s282_s6 = scalar_lea.vmem %s935_s5, %s661_s28 }
  0x11   : > { %v682_v20 = vunpack.c.l.bf16 %v712_v10  ;;  %v683_v22 = vunpack.c.h.bf16 %v712_v10  ;;  %v690_v24 = vunpack.c.l.bf16 %v714_v15  ;;  %v691_v25 = vunpack.c.h.bf16 %v714_v15  ;;  %v801_v43 = vld [vmem:[%s931_s1] sm:$0xff]  }
  0x12   : > { %733 = vmatpush3.bf16.msra.mxu0 %v795_v1  ;;  %763 = vmatpush3.bf16.msra.mxu1 %v795_v1  ;;  %v307_v13 = vmul.f32 %v678_v6, %v662_v5  ;;  %v308_v14 = vmul.f32 %v679_v7, %v662_v5  ;;  %v311_v17 = vmul.f32 %v686_v11, %v662_v5 }
  0x13   : > { %734 = vmatprep.subr.bf16.mxu0 %v796_v2  ;;  %756 = vmatprep.subr.bf16.mxu1 %v796_v2  ;;  %v312_v21 = vmul.f32 %v687_v12, %v662_v5  ;;  %v309_v33 = vmul.f32 %v682_v20, %v662_v5  ;;  %v310_v34 = vmul.f32 %v683_v22, %v662_v5 }
  0x14   : > { %v322_v18 = vadd.f32 %v663_v9, %v307_v13  ;;  %v323_v19 = vadd.f32 %v663_v9, %v308_v14  ;;  %v326_v23 = vadd.f32 %v663_v9, %v311_v17  ;;  %v313_v35 = vmul.f32 %v690_v24, %v662_v5 }
  0x15   : > { %v327_v28 = vadd.f32 %v663_v9, %v312_v21  ;;  %v314_v36 = vmul.f32 %v691_v25, %v662_v5  ;;  %v324_v39 = vadd.f32 %v663_v9, %v309_v33  ;;  %v325_v40 = vadd.f32 %v663_v9, %v310_v34 }
  0x16   : > { %735 = vmatpush3.bf16.msra.mxu0 %v796_v2  ;;  %764 = vmatpush3.bf16.msra.mxu1 %v796_v2  ;;  %v330_v26 = vmax.f32 %v322_v18, 0.0  ;;  %v331_v27 = vmax.f32 %v323_v19, 0.0  ;;  %v334_v30 = vmax.f32 %v326_v23, 0.0  ;;  %v328_v41 = vadd.f32 %v663_v9, %v313_v35 }
  0x17   : > { %736 = vmatprep.subr.bf16.mxu0 %v797_v3  ;;  %757 = vmatprep.subr.bf16.mxu1 %v797_v3  ;;  %v335_v32 = vmax.f32 %v327_v28, 0.0  ;;  %v329_v42 = vadd.f32 %v663_v9, %v314_v36  ;;  %v332_v44 = vmax.f32 %v324_v39, 0.0  ;;  %v333_v45 = vmax.f32 %v325_v40, 0.0 }
  0x18   : > { %v338_v31 = vpack.c.bf16 %v331_v27, %v330_v26  ;;  %v336_v46 = vmax.f32 %v328_v41, 0.0 }
  0x19   : > { %v340_v37 = vpack.c.bf16 %v335_v32, %v334_v30  ;;  %v337_v47 = vmax.f32 %v329_v42, 0.0  ;;  %v339_v48 = vpack.c.bf16 %v333_v45, %v332_v44 }
  0x1a   : > { %737 = vmatpush3.bf16.msra.mxu0 %v797_v3  ;;  %765 = vmatpush3.bf16.msra.mxu1 %v797_v3 }
  0x1b   : > { %738 = vmatprep.subr.bf16.mxu0 %v798_v16  ;;  %758 = vmatprep.subr.bf16.mxu1 %v798_v16  ;;  %v341_v49 = vpack.c.bf16 %v337_v47, %v336_v46 }
  0x1c   : > { %746 = vmatprep.mubr.bf16.mxu0 %v338_v31  ;;  %750 = vmatprep.mubr.bf16.mxu1 %v340_v37 }
  0x1e   : > { %739 = vmatpush3.bf16.msra.mxu0 %v798_v16  ;;  %766 = vmatpush3.bf16.msra.mxu1 %v798_v16 }
  0x1f   : > { %740 = vmatprep.subr.bf16.mxu0 %v799_v29  ;;  %759 = vmatprep.subr.bf16.mxu1 %v799_v29 }
  0x22   : > { %741 = vmatpush3.bf16.msra.mxu0 %v799_v29  ;;  %767 = vmatpush3.bf16.msra.mxu1 %v799_v29 }
  0x23   : > { %742 = vmatprep.subr.bf16.mxu0 %v800_v38  ;;  %760 = vmatprep.subr.bf16.mxu1 %v800_v38 }
  0x26   : > { %743 = vmatpush3.bf16.msra.mxu0 %v800_v38  ;;  %768 = vmatpush3.bf16.msra.mxu1 %v800_v38 }
  0x27   : > { %744 = vmatprep.subr.bf16.mxu0 %v801_v43  ;;  %761 = vmatprep.subr.bf16.mxu1 %v801_v43 }
  0x2a   : > { %745 = vmatpush3.bf16.msra.mxu0 %v801_v43  ;;  %769 = vmatpush3.bf16.msra.mxu1 %v801_v43 }
  0x2d   : > { %747 = vmatmul.mubr.bf16.vlgmr.msra.gmra.mxu0 %v339_v48  ;;  %751 = vmatmul.mubr.bf16.vlgmr.msra.gmra.mxu1 %v341_v49 }
  0xed   : > { %v748_v50 = vpop.f32.mrf.mxu0  ;;  %v752_v51 = vpop.f32.mrf.mxu1 }
  0xee   : > { %v502_v1 = vmul.f32 %v748_v50, %v748_v50  ;;  %v506_v13 = vmul.f32 %v752_v51, %v752_v51 }
  0xef   : > { %v440_v52 = vpop.f32.mrf.mxu0  ;;  %v456_v53 = vpop.f32.mrf.mxu1 }
  0xf0   : > { %v500_v58 = vmul.f32 %v440_v52, %v440_v52  ;;  %v504_v7 = vmul.f32 %v456_v53, %v456_v53 }
  0xf1   : > { %v749_v54 = vpop.f32.mrf.mxu0  ;;  %v753_v55 = vpop.f32.mrf.mxu1 }
  0xf2   : > { %v700_v56 = vpack.c.bf16 %v749_v54, %v748_v50  ;;  %v710_v57 = vpack.c.bf16 %v753_v55, %v752_v51  ;;  %v503_v4 = vmul.f32 %v749_v54, %v749_v54  ;;  %v507_v16 = vmul.f32 %v753_v55, %v753_v55 }
  0xf3   : > { %v443_v59 = vpop.f32.mrf.mxu0  ;;  %v459_v60 = vpop.f32.mrf.mxu1 }
  0xf4   : > { %715 = vst [vmem:[%s274_s27 + $0x8] sm:$0xff] %v700_v56   ;;  %v695_v61 = vpack.c.bf16 %v443_v59, %v440_v52  ;;  %v487_v62 = vadd.f32 %v443_v59, %v440_v52  ;;  %v501_v63 = vmul.f32 %v443_v59, %v443_v59  ;;  %717 = vst [vmem:[%s274_s27 + $0x18] sm:$0xff] %v710_v57  }
  0xf5   : > { %v705_v0 = vpack.c.bf16 %v459_v60, %v456_v53  ;;  %v505_v11 = vmul.f32 %v459_v60, %v459_v60 }
  0xf6   : > { %696 = vst [vmem:[%s274_s27] sm:$0xff] %v695_v61   ;;  %v488_v2 = vadd.f32 %v748_v50, %v487_v62  ;;  %v508_v3 = vadd.f32 %v501_v63, %v500_v58 }
  0xf7   : > { %716 = vst [vmem:[%s274_s27 + $0x10] sm:$0xff] %v705_v0  }
  0xf8   : > { %v509_v5 = vadd.f32 %v508_v3, %v502_v1  ;;  %v489_v6 = vadd.f32 %v749_v54, %v488_v2 }
  0xfa   : > { %v490_v8 = vadd.f32 %v489_v6, %v456_v53  ;;  %v510_v9 = vadd.f32 %v509_v5, %v503_v4 }
  0xfc   : > { %v491_v10 = vadd.f32 %v490_v8, %v459_v60  ;;  %v511_v12 = vadd.f32 %v510_v9, %v504_v7 }
  0xfe   : > { %v492_v14 = vadd.f32 %v752_v51, %v491_v10  ;;  %v512_v15 = vadd.f32 %v511_v12, %v505_v11 }
 0x100   : > { %v493_v17 = vadd.f32 %v753_v55, %v492_v14  ;;  %v513_v18 = vadd.f32 %v512_v15, %v506_v13 }
 0x102   : > { %v494_v19 = vrot.slane %v493_v17, 4  ;;  %v514_v20 = vadd.f32 %v513_v18, %v507_v16 }
 0x104   : > { %v495_v21 = vadd.f32 %v494_v19, %v493_v17  ;;  %v515_v22 = vrot.slane %v514_v20, 4 }
 0x106   : > { %v496_v23 = vrot.slane %v495_v21, 2  ;;  %v516_v24 = vadd.f32 %v515_v22, %v514_v20 }
 0x108   : > { %v497_v25 = vadd.f32 %v496_v23, %v495_v21  ;;  %v517_v26 = vrot.slane %v516_v24, 2 }
 0x10a   : > { %v498_v27 = vrot.slane %v497_v25, 1  ;;  %v518_v28 = vadd.f32 %v517_v26, %v516_v24 }
 0x10c   : > { %v519_v29 = vrot.slane %v518_v28, 1  ;;  %v499_v30 = vadd.f32 %v498_v27, %v497_v25 }
 0x10e   : > { %v520_v31 = vadd.f32 %v519_v29, %v518_v28 }
 0x110   : > { %v522_v32 = vsel %vm521_vm0, %v499_v30, %v520_v31 }
 0x111   : > { %523 = vst [vmem:[%s282_s6] sm:$0x3] %v522_v32 }
 0x112 PF: > { %s16_s20 = sadd.s32 1, %s824_s20   ;;  %s936_s18 = smov %s820_s19 }
 0x113   : > { %p13_p5 = scmp.ge.s32.totalorder %s16_s20, 4   ;;  %s937_s19 = smov %s939_s21 }
 0x115   :  { %15 = sbr.rel (!%p13_p5) target bundleno = 2 (0x2), region = 78 }

// kernel: bottleneck_forward.9
= control target key start
LH: loop header
LB: loop body
LE: loop exit
PB: predicated region body
PF: predicated region fallthrough
CT: control target
= control target key end

     0   :  { %s647_s0 = inlined_call_operand.vmem [shape: bf16[128,128], index: 0, kind: input, shape index: {}]   ;;  %s648_s1 = inlined_call_operand.vmem [shape: bf16[128,128], index: 1, kind: input, shape index: {}]   ;;  %s649_s2 = inlined_call_operand.vmem [shape: f32[1,128], index: 2, kind: input, shape index: {}]   ;;  %s650_s3 = inlined_call_operand.vmem [shape: f32[1,128], index: 3, kind: input, shape index: {}]   ;;  %s651_s4 = inlined_call_operand.vmem [shape: f32[1,128], index: 4, kind: input, shape index: {}]   ;;  %s652_s5 = inlined_call_operand.vmem [shape: f32[1,128], index: 5, kind: input, shape index: {}]   ;;  %s653_s6 = inlined_call_operand.vmem [shape: bf16[128,128], index: 6, kind: output, shape index: {}]  }
   0x1   :  { %v332_v0 = vld [vmem:[%s647_s0] sm:$0xff]   ;;  %v435_v9 = vld [vmem:[%s647_s0 + $0x8] sm:$0xff]   ;;  %v436_v11 = vld [vmem:[%s647_s0 + $0x10] sm:$0xff]  }
   0x2   :  { %v364_v1 = vld [vmem:[%s648_s1] sm:$0xff]   ;;  %v333_v3 = vunpack.c.l.bf16 %v332_v0  ;;  %v334_v4 = vunpack.c.h.bf16 %v332_v0  ;;  %v442_v10 = vld [vmem:[%s648_s1 + $0x8] sm:$0xff]   ;;  %v337_v16 = vunpack.c.l.bf16 %v435_v9  ;;  %v338_v17 = vunpack.c.h.bf16 %v435_v9  ;;  %v443_v20 = vld [vmem:[%s648_s1 + $0x10] sm:$0xff]  }
   0x3   :  { %v500_v2 = vld [vmem:[%s649_s2] ss:$0 sm:$0xff]  ;;  %v365_v5 = vunpack.c.l.bf16 %v364_v1  ;;  %v366_v6 = vunpack.c.h.bf16 %v364_v1  ;;  %v369_v18 = vunpack.c.l.bf16 %v442_v10  ;;  %v370_v19 = vunpack.c.h.bf16 %v442_v10  ;;  %v437_v38 = vld [vmem:[%s647_s0 + $0x18] sm:$0xff]   ;;  %v439_v9 = vld [vmem:[%s647_s0 + $0x28] sm:$0xff]  }
   0x4   :  { %v505_v7 = vld [vmem:[%s650_s3] ss:$0 sm:$0xff]  ;;  %v94_v12 = vmul.f32 %v333_v3, %v500_v2  ;;  %v95_v13 = vmul.f32 %v334_v4, %v500_v2  ;;  %v341_v23 = vunpack.c.l.bf16 %v436_v11  ;;  %v342_v24 = vunpack.c.h.bf16 %v436_v11  ;;  %v444_v47 = vld [vmem:[%s648_s1 + $0x18] sm:$0xff]  }
   0x5   :  { %v510_v8 = vld [vmem:[%s651_s4] ss:$0 sm:$0xff]  ;;  %v96_v26 = vmul.f32 %v337_v16, %v500_v2  ;;  %v97_v27 = vmul.f32 %v338_v17, %v500_v2  ;;  %v373_v32 = vunpack.c.l.bf16 %v443_v20  ;;  %v374_v33 = vunpack.c.h.bf16 %v443_v20 }
   0x6   :  { %v140_v14 = vmul.f32 %v365_v5, %v510_v8  ;;  %v141_v15 = vmul.f32 %v366_v6, %v510_v8  ;;  %v117_v21 = vadd.f32 %v505_v7, %v94_v12  ;;  %v118_v22 = vadd.f32 %v505_v7, %v95_v13  ;;  %v533_v25 = vld [vmem:[%s652_s5] ss:$0 sm:$0xff] }
   0x7   :  { %v142_v28 = vmul.f32 %v369_v18, %v510_v8  ;;  %v143_v29 = vmul.f32 %v370_v19, %v510_v8  ;;  %v119_v34 = vadd.f32 %v505_v7, %v96_v26  ;;  %v120_v35 = vadd.f32 %v505_v7, %v97_v27  ;;  %v438_v60 = vld [vmem:[%s647_s0 + $0x20] sm:$0xff]   ;;  %v446_v18 = vld [vmem:[%s648_s1 + $0x28] sm:$0xff]  }
   0x8   :  { %v156_v30 = vadd.f32 %v140_v14, %v117_v21  ;;  %v157_v31 = vadd.f32 %v141_v15, %v118_v22  ;;  %v98_v36 = vmul.f32 %v341_v23, %v500_v2  ;;  %v99_v37 = vmul.f32 %v342_v24, %v500_v2  ;;  %v445_v1 = vld [vmem:[%s648_s1 + $0x20] sm:$0xff]  }
   0x9   :  { %v144_v41 = vmul.f32 %v373_v32, %v510_v8  ;;  %v145_v42 = vmul.f32 %v374_v33, %v510_v8  ;;  %v158_v43 = vadd.f32 %v142_v28, %v119_v34  ;;  %v159_v44 = vadd.f32 %v143_v29, %v120_v35  ;;  %v440_v32 = vld [vmem:[%s647_s0 + $0x30] sm:$0xff]  }
   0xa   :  { %v179_v39 = vadd.f32 %v533_v25, %v156_v30  ;;  %v180_v40 = vadd.f32 %v533_v25, %v157_v31  ;;  %v121_v45 = vadd.f32 %v505_v7, %v98_v36  ;;  %v122_v46 = vadd.f32 %v505_v7, %v99_v37 }
   0xb   :  { %v345_v50 = vunpack.c.l.bf16 %v437_v38  ;;  %v346_v51 = vunpack.c.h.bf16 %v437_v38  ;;  %v181_v52 = vadd.f32 %v533_v25, %v158_v43  ;;  %v182_v53 = vadd.f32 %v533_v25, %v159_v44 }
   0xc   :  { %v195_v48 = vmax.f32 %v179_v39, 0.0  ;;  %v196_v49 = vmax.f32 %v180_v40, 0.0  ;;  %v160_v54 = vadd.f32 %v144_v41, %v121_v45  ;;  %v161_v55 = vadd.f32 %v145_v42, %v122_v46  ;;  %v447_v41 = vld [vmem:[%s648_s1 + $0x30] sm:$0xff]  }
   0xd   :  { %v377_v57 = vunpack.c.l.bf16 %v444_v47  ;;  %v378_v58 = vunpack.c.h.bf16 %v444_v47  ;;  %v100_v59 = vmul.f32 %v345_v50, %v500_v2  ;;  %v197_v61 = vmax.f32 %v181_v52, 0.0 }
   0xe   :  { %v398_v56 = vpack.c.bf16 %v196_v49, %v195_v48  ;;  %v198_v62 = vmax.f32 %v182_v53, 0.0  ;;  %v183_v63 = vadd.f32 %v533_v25, %v160_v54  ;;  %v184_v0 = vadd.f32 %v533_v25, %v161_v55  ;;  %v441_v54 = vld [vmem:[%s647_s0 + $0x38] sm:$0xff]  }
   0xf   :  { %v101_v3 = vmul.f32 %v346_v51, %v500_v2  ;;  %v123_v4 = vadd.f32 %v505_v7, %v100_v59  ;;  %v146_v5 = vmul.f32 %v377_v57, %v510_v8  ;;  %v147_v6 = vmul.f32 %v378_v58, %v510_v8  ;;  %v448_v59 = vld [vmem:[%s648_s1 + $0x38] sm:$0xff]  }
  0x10   :  { %399 = vst [vmem:[%s653_s6] sm:$0xff] %v398_v56   ;;  %v403_v10 = vpack.c.bf16 %v198_v62, %v197_v61  ;;  %v199_v11 = vmax.f32 %v183_v63, 0.0  ;;  %v200_v12 = vmax.f32 %v184_v0, 0.0  ;;  %v349_v13 = vunpack.c.l.bf16 %v438_v60 }
  0x11   :  { %v124_v14 = vadd.f32 %v505_v7, %v101_v3  ;;  %v162_v15 = vadd.f32 %v146_v5, %v123_v4  ;;  %v350_v16 = vunpack.c.h.bf16 %v438_v60  ;;  %v381_v17 = vunpack.c.l.bf16 %v445_v1 }
  0x12   :  { %449 = vst [vmem:[%s653_s6 + $0x8] sm:$0xff] %v403_v10   ;;  %v408_v19 = vpack.c.bf16 %v200_v12, %v199_v11  ;;  %v382_v20 = vunpack.c.h.bf16 %v445_v1  ;;  %v102_v21 = vmul.f32 %v349_v13, %v500_v2  ;;  %v353_v22 = vunpack.c.l.bf16 %v439_v9 }
  0x13   :  { %v163_v23 = vadd.f32 %v147_v6, %v124_v14  ;;  %v185_v24 = vadd.f32 %v533_v25, %v162_v15  ;;  %v103_v26 = vmul.f32 %v350_v16, %v500_v2  ;;  %v148_v27 = vmul.f32 %v381_v17, %v510_v8 }
  0x14   :  { %450 = vst [vmem:[%s653_s6 + $0x10] sm:$0xff] %v408_v19   ;;  %v125_v28 = vadd.f32 %v505_v7, %v102_v21  ;;  %v149_v29 = vmul.f32 %v382_v20, %v510_v8  ;;  %v354_v30 = vunpack.c.h.bf16 %v439_v9  ;;  %v385_v31 = vunpack.c.l.bf16 %v446_v18 }
  0x15   :  { %v186_v33 = vadd.f32 %v533_v25, %v163_v23  ;;  %v201_v34 = vmax.f32 %v185_v24, 0.0  ;;  %v126_v35 = vadd.f32 %v505_v7, %v103_v26  ;;  %v386_v36 = vunpack.c.h.bf16 %v446_v18 }
  0x16   :  { %v164_v37 = vadd.f32 %v148_v27, %v125_v28  ;;  %v104_v38 = vmul.f32 %v353_v22, %v500_v2  ;;  %v105_v39 = vmul.f32 %v354_v30, %v500_v2  ;;  %v150_v40 = vmul.f32 %v385_v31, %v510_v8 }
  0x17   :  { %v202_v42 = vmax.f32 %v186_v33, 0.0  ;;  %v165_v43 = vadd.f32 %v149_v29, %v126_v35  ;;  %v151_v44 = vmul.f32 %v386_v36, %v510_v8  ;;  %v357_v45 = vunpack.c.l.bf16 %v440_v32 }
  0x18   :  { %v187_v46 = vadd.f32 %v533_v25, %v164_v37  ;;  %v127_v47 = vadd.f32 %v505_v7, %v104_v38  ;;  %v128_v48 = vadd.f32 %v505_v7, %v105_v39  ;;  %v358_v49 = vunpack.c.h.bf16 %v440_v32 }
  0x19   :  { %v413_v50 = vpack.c.bf16 %v202_v42, %v201_v34  ;;  %v188_v51 = vadd.f32 %v533_v25, %v165_v43  ;;  %v389_v52 = vunpack.c.l.bf16 %v447_v41  ;;  %v390_v53 = vunpack.c.h.bf16 %v447_v41 }
  0x1a   :  { %v203_v55 = vmax.f32 %v187_v46, 0.0  ;;  %v166_v56 = vadd.f32 %v150_v40, %v127_v47  ;;  %v167_v57 = vadd.f32 %v151_v44, %v128_v48  ;;  %v106_v58 = vmul.f32 %v357_v45, %v500_v2 }
  0x1b   :  { %451 = vst [vmem:[%s653_s6 + $0x18] sm:$0xff] %v413_v50   ;;  %v204_v60 = vmax.f32 %v188_v51, 0.0  ;;  %v107_v61 = vmul.f32 %v358_v49, %v500_v2  ;;  %v152_v62 = vmul.f32 %v389_v52, %v510_v8  ;;  %v153_v63 = vmul.f32 %v390_v53, %v510_v8 }
  0x1c   :  { %v189_v0 = vadd.f32 %v533_v25, %v166_v56  ;;  %v190_v1 = vadd.f32 %v533_v25, %v167_v57  ;;  %v129_v3 = vadd.f32 %v505_v7, %v106_v58  ;;  %v361_v4 = vunpack.c.l.bf16 %v441_v54 }
  0x1d   :  { %v418_v5 = vpack.c.bf16 %v204_v60, %v203_v55  ;;  %v130_v6 = vadd.f32 %v505_v7, %v107_v61  ;;  %v362_v9 = vunpack.c.h.bf16 %v441_v54  ;;  %v393_v10 = vunpack.c.l.bf16 %v448_v59 }
  0x1e   :  { %v205_v11 = vmax.f32 %v189_v0, 0.0  ;;  %v206_v12 = vmax.f32 %v190_v1, 0.0  ;;  %v168_v13 = vadd.f32 %v152_v62, %v129_v3  ;;  %v394_v14 = vunpack.c.h.bf16 %v448_v59 }
  0x1f   :  { %452 = vst [vmem:[%s653_s6 + $0x20] sm:$0xff] %v418_v5   ;;  %v169_v15 = vadd.f32 %v153_v63, %v130_v6  ;;  %v108_v16 = vmul.f32 %v361_v4, %v500_v2  ;;  %v109_v17 = vmul.f32 %v362_v9, %v500_v2  ;;  %v154_v18 = vmul.f32 %v393_v10, %v510_v8 }
  0x20   :  { %v423_v19 = vpack.c.bf16 %v206_v12, %v205_v11  ;;  %v191_v20 = vadd.f32 %v533_v25, %v168_v13  ;;  %v155_v21 = vmul.f32 %v394_v14, %v510_v8 }
  0x21   :  { %v192_v22 = vadd.f32 %v533_v25, %v169_v15  ;;  %v131_v23 = vadd.f32 %v505_v7, %v108_v16  ;;  %v132_v24 = vadd.f32 %v505_v7, %v109_v17 }
  0x22   :  { %453 = vst [vmem:[%s653_s6 + $0x28] sm:$0xff] %v423_v19   ;;  %v207_v26 = vmax.f32 %v191_v20, 0.0 }
  0x23   :  { %v208_v27 = vmax.f32 %v192_v22, 0.0  ;;  %v170_v2 = vadd.f32 %v154_v18, %v131_v23  ;;  %v171_v28 = vadd.f32 %v155_v21, %v132_v24 }
  0x25   :  { %v428_v29 = vpack.c.bf16 %v208_v27, %v207_v26  ;;  %v193_v30 = vadd.f32 %v533_v25, %v170_v2  ;;  %v194_v31 = vadd.f32 %v533_v25, %v171_v28 }
  0x27   :  { %454 = vst [vmem:[%s653_s6 + $0x30] sm:$0xff] %v428_v29   ;;  %v209_v8 = vmax.f32 %v193_v30, 0.0  ;;  %v210_v32 = vmax.f32 %v194_v31, 0.0 }
  0x29   :  { %v433_v7 = vpack.c.bf16 %v210_v32, %v209_v8 }
  0x2b   :  { %455 = vst [vmem:[%s653_s6 + $0x38] sm:$0xff] %v433_v7  }

// kernel: bottleneck_forward.6
= control target key start
LH: loop header
LB: loop body
LE: loop exit
PB: predicated region body
PF: predicated region fallthrough
CT: control target
= control target key end

     0   :  { %s2419_s12 = smov 0   ;;  %s2421_s13 = smov 0   ;;  %s2988_s0 = inlined_call_operand.vmem [shape: bf16[2,19,10,256], index: 0, kind: input, shape index: {}]   ;;  %s2989_s1 = inlined_call_operand.vmem [shape: bf16[1152,128], index: 1, kind: input, shape index: {}]   ;;  %s2990_s2 = inlined_call_operand.vmem [shape: bf16[2,8,8,128], index: 2, kind: output, shape index: {0}]   ;;  %s2991_s3 = inlined_call_operand.vmem [shape: f32[2,1,2,128], index: 3, kind: output, shape index: {1}]  }
   0x1   :  { %s2423_s14 = smov 0  }
   0x2 LB: > { %s26_s15 = sadd.s32 1, %s2393_s13  ;;  %p1895_p0 = scmp.ge.s32.totalorder %s2397_s14, 1  ;;  %s2397_s14 = sphi %s2423_s14, %s14_s14   ;;  %s2393_s13 = sphi %s2421_s13, %s3007_s13   ;;  %s2389_s12 = sphi %s2419_s12, %s3006_s12  }
   0x3   : > { %p28_p1 = scmp.ge.s32.totalorder %s26_s15, 2  ;;  %p156_p2 = scmp.lt.s32.totalorder %s2397_s14, 3 }
   0x5   : > { %s3009_s15 = smov (%p28_p1, %s26_s15), 0  ;;  %p157_p3 = pnand %p1895_p0, %p156_p2 }
   0x7   : > { %160 = sbr.rel (%p157_p3) target bundleno = 342 (0x156), region = 28 }
   0xc   : > { %v2303_v0 = vld [vmem:[%s2989_s1 + $0x78] sm:$0xff]   ;;  %v2307_v4 = vld [vmem:[%s2989_s1 + $0x70] sm:$0xff]   ;;  %v2311_v8 = vld [vmem:[%s2989_s1 + $0x68] sm:$0xff]   ;;  %p191_p4 = scmp.lt.s32.totalorder %s2389_s12, 1  ;;  %vm250_vm0 = vsmask.f32 3328 }
   0xd   : > { %v2304_v1 = vld [vmem:[%s2989_s1 + $0xf8] sm:$0xff]   ;;  %2066 = vmatprep.subr.bf16.mxu0 %v2303_v0  ;;  %v2308_v5 = vld [vmem:[%s2989_s1 + $0xf0] sm:$0xff]   ;;  %v2312_v9 = vld [vmem:[%s2989_s1 + $0xe8] sm:$0xff]   ;;  %vm251_vm1 = vsmask.f32 7440  ;;  %vm1756_vm3 = vcmask 1040384  }
   0xe   : > { %v2305_v2 = vld [vmem:[%s2989_s1 + $0x38] sm:$0xff]   ;;  %2106 = vmatprep.subr.bf16.mxu1 %v2304_v1  ;;  %v2309_v6 = vld [vmem:[%s2989_s1 + $0x30] sm:$0xff]   ;;  %v2313_v10 = vld [vmem:[%s2989_s1 + $0x28] sm:$0xff]   ;;  %s3011_s12 = smov (!%p191_p4, %s2389_s12), 1 }
   0xf   : > { %v2306_v3 = vld [vmem:[%s2989_s1 + $0xb8] sm:$0xff]   ;;  %2067 = vmatpush3.bf16.msra.mxu0 %v2305_v2  ;;  %v2310_v7 = vld [vmem:[%s2989_s1 + $0xb0] sm:$0xff]   ;;  %v2314_v11 = vld [vmem:[%s2989_s1 + $0xa8] sm:$0xff]   ;;  %s2278_s22 = smul.u32 304, %s3011_s12  ;;  %s2042_s28 = sshll.u32 %s3011_s12, 5 }
  0x10   : > { %2107 = vmatpush3.bf16.msra.mxu1 %v2306_v3  ;;  %2068 = vmatprep.subr.bf16.mxu0 %v2307_v4  ;;  %v2315_v12 = vld [vmem:[%s2989_s1 + $0x60] sm:$0xff]   ;;  %v2319_v16 = vld [vmem:[%s2989_s1 + $0x58] sm:$0xff]   ;;  %v2323_v20 = vld [vmem:[%s2989_s1 + $0x50] sm:$0xff]   ;;  %s204_s4 = scalar_lea.vmem %s2990_s2, %s2042_s28  ;;  %s1899_s5 = sshll.u32 %s3011_s12, 1 }
  0x11   : > { %2108 = vmatprep.subr.bf16.mxu1 %v2308_v5  ;;  %v2316_v13 = vld [vmem:[%s2989_s1 + $0xe0] sm:$0xff]   ;;  %v2320_v17 = vld [vmem:[%s2989_s1 + $0xd8] sm:$0xff]   ;;  %v2324_v21 = vld [vmem:[%s2989_s1 + $0xd0] sm:$0xff]   ;;  %s2537_s6 = scalar_lea.vmem %s2988_s0, %s2278_s22  ;;  %s212_s9 = scalar_lea.vmem %s2991_s3, %s1899_s5 }
  0x12   : > { %v2317_v14 = vld [vmem:[%s2989_s1 + $0x20] sm:$0xff]   ;;  %v2321_v18 = vld [vmem:[%s2989_s1 + $0x18] sm:$0xff]   ;;  %v2325_v22 = vld [vmem:[%s2989_s1 + $0x10] sm:$0xff]  }
  0x13   : > { %2069 = vmatpush3.bf16.msra.mxu0 %v2309_v6  ;;  %v2318_v15 = vld [vmem:[%s2989_s1 + $0xa0] sm:$0xff]   ;;  %v2322_v19 = vld [vmem:[%s2989_s1 + $0x98] sm:$0xff]   ;;  %v2326_v23 = vld [vmem:[%s2989_s1 + $0x90] sm:$0xff]  }
  0x14   : > { %2109 = vmatpush3.bf16.msra.mxu1 %v2310_v7  ;;  %2070 = vmatprep.subr.bf16.mxu0 %v2311_v8  ;;  %v2327_v24 = vld [vmem:[%s2989_s1 + $0x48] sm:$0xff]   ;;  %v2331_v28 = vld [vmem:[%s2989_s1 + $0x40] sm:$0xff]   ;;  %v2335_v38 = vld [vmem:[%s2989_s1 + $0x178] sm:$0xff]  }
  0x15   : > { %2110 = vmatprep.subr.bf16.mxu1 %v2312_v9  ;;  %v2328_v25 = vld [vmem:[%s2989_s1 + $0xc8] sm:$0xff]   ;;  %v2332_v29 = vld [vmem:[%s2989_s1 + $0xc0] sm:$0xff]   ;;  %v2556_v41 = vld [vmem:[%s2537_s6 + $0x10] sm:$0xff] }
  0x16   : > { %v2329_v26 = vld [vmem:[%s2989_s1 + $0x8] sm:$0xff]   ;;  %v2333_v30 = vld [vmem:[%s2989_s1] sm:$0xff]   ;;  %v2559_v42 = vld [vmem:[%s2537_s6 + $0x30] sm:$0xff]  ;;  %v393_v46 = vrot.slane %v2556_v41, 4  ;;  %v402_v54 = vshrl.u32 %v2556_v41, 16  ;;  %v405_v56 = vshll.u32 %v2556_v41, 16 }
  0x17   : > { %2071 = vmatpush3.bf16.msra.mxu0 %v2313_v10  ;;  %v2330_v27 = vld [vmem:[%s2989_s1 + $0x88] sm:$0xff]   ;;  %v2334_v31 = vld [vmem:[%s2989_s1 + $0x80] sm:$0xff]   ;;  %v2336_v47 = vld [vmem:[%s2989_s1 + $0x1f8] sm:$0xff]   ;;  %v1944_v51 = vcombine.low %v2556_v41, %v2559_v42  ;;  %v394_v53 = vrot.slane %v2559_v42, 4  ;;  %v416_v63 = vshrl.u32 %v2559_v42, 16  ;;  %v419_v5 = vshll.u32 %v2559_v42, 16 }
  0x18   : > { %2111 = vmatpush3.bf16.msra.mxu1 %v2314_v11  ;;  %2072 = vmatprep.subr.bf16.mxu0 %v2315_v12  ;;  %v218_v32 = vld [vmem:[%s2537_s6] sm:$0xff]  ;;  %v219_v50 = vld [vmem:[%s2537_s6 + $0x8] sm:$0x11]  ;;  %vm2576_vm2 = vmor %vm250_vm0, %vm251_vm1  ;;  %v2595_v8 = vrot.slane %v402_v54, 4  ;;  %v2603_v11 = vrot.slane %v405_v56, 5 }
  0x19   : > { %2112 = vmatprep.subr.bf16.mxu1 %v2316_v13  ;;  %v2547_v33 = vld [vmem:[%s2537_s6 + $0x20] sm:$0xff]  ;;  %v242_v34 = vrot.slane %v218_v32, 4  ;;  %v254_v36 = vshrl.u32 %v218_v32, 16  ;;  %v257_v37 = vshll.u32 %v218_v32, 16  ;;  %v221_v52 = vld [vmem:[%s2537_s6 + $0x28] sm:$0x11]  ;;  %1478 = vmatprep.mubr.bf16.mxu1 %v1944_v51 }
  0x1a   : > { %v243_v35 = vrot.slane %v2547_v33, 4  ;;  %v268_v39 = vshrl.u32 %v2547_v33, 16  ;;  %v271_v40 = vshll.u32 %v2547_v33, 16  ;;  %v1932_v55 = vcombine.low %v218_v32, %v2547_v33  ;;  %v2337_v62 = vld [vmem:[%s2989_s1 + $0x138] sm:$0xff]   ;;  %v2339_v4 = vld [vmem:[%s2989_s1 + $0x170] sm:$0xff]  }
  0x1b   : > { %2073 = vmatpush3.bf16.msra.mxu0 %v2317_v14  ;;  %v256_v43 = vrot.slane %v254_v36, 4  ;;  %v259_v44 = vrot.slane %v257_v37, 5  ;;  %v263_v59 = vshll.u32 %v219_v50, 16  ;;  %v277_v61 = vshll.u32 %v221_v52, 16  ;;  %v2338_v7 = vld [vmem:[%s2989_s1 + $0x1b8] sm:$0xff]   ;;  %v2341_v10 = vld [vmem:[%s2989_s1 + $0x130] sm:$0xff]  }
  0x1c   : > { %2113 = vmatpush3.bf16.msra.mxu1 %v2318_v15  ;;  %2074 = vmatprep.subr.bf16.mxu0 %v2319_v16  ;;  %v1936_v45 = vcombine.low %v242_v34, %v243_v35  ;;  %v270_v48 = vrot.slane %v268_v39, 4  ;;  %v273_v49 = vrot.slane %v271_v40, 5  ;;  %v2605_v12 = vrot.slane %v416_v63, 4  ;;  %v2340_v14 = vld [vmem:[%s2989_s1 + $0x1f0] sm:$0xff]   ;;  %v2611_v15 = vld [vmem:[%s2537_s6 + $0x40] sm:$0xff]  ;;  %v2346_v52 = vld [vmem:[%s2989_s1 + $0x1a8] sm:$0xff]  }
  0x1d   : > { %2114 = vmatprep.subr.bf16.mxu1 %v2320_v17  ;;  %v260_v58 = vor.u32 %v259_v44, %v256_v43  ;;  %v265_v1 = vrot.slane %v263_v59, 5  ;;  %v279_v3 = vrot.slane %v277_v61, 5  ;;  %v2614_v16 = vld [vmem:[%s2537_s6 + $0x60] sm:$0xff]  ;;  %v244_v17 = vrot.slane %v2611_v15, 4 }
  0x1e   : > { %1413 = vmatprep.mubr.bf16.mxu0 %v1936_v45  ;;  %v274_v60 = vor.u32 %v273_v49, %v270_v48  ;;  %v296_v37 = vshrl.u32 %v2614_v16, 16  ;;  %v299_v39 = vshll.u32 %v2614_v16, 16  ;;  %v2345_v48 = vld [vmem:[%s2989_s1 + $0x128] sm:$0xff]   ;;  %v408_v54 = vor.u32 %v2603_v11, %v2595_v8  ;;  %v2347_v59 = vld [vmem:[%s2989_s1 + $0x160] sm:$0xff]  }
  0x1f   : > { %2075 = vmatpush3.bf16.msra.mxu0 %v2321_v18  ;;  %v261_v0 = vrot.slane %v260_v58, 4  ;;  %v2618_v18 = vld [vmem:[%s2537_s6 + $0x50] sm:$0xff]  ;;  %v2348_v61 = vld [vmem:[%s2989_s1 + $0x1e0] sm:$0xff]  }
  0x20   : > { %2115 = vmatpush3.bf16.msra.mxu1 %v2322_v19  ;;  %2076 = vmatprep.subr.bf16.mxu0 %v2323_v20  ;;  %v2584_v2 = vrot.slane %v274_v60, 4  ;;  %v2621_v19 = vld [vmem:[%s2537_s6 + $0x70] sm:$0xff]  ;;  %v282_v20 = vshrl.u32 %v2611_v15, 16  ;;  %v298_v45 = vrot.slane %v296_v37, 4  ;;  %v301_v50 = vrot.slane %v299_v39, 5 }
  0x21   : > { %2116 = vmatprep.subr.bf16.mxu1 %v2324_v21  ;;  %v266_v6 = vsel %vm2576_vm2, %v261_v0, %v265_v1  ;;  %v285_v21 = vshll.u32 %v2611_v15, 16  ;;  %v444_v43 = vshrl.u32 %v2621_v19, 16  ;;  %v447_v60 = vshll.u32 %v2621_v19, 16  ;;  %v2349_v0 = vld [vmem:[%s2989_s1 + $0x120] sm:$0xff]  }
  0x22   : > { %v280_v9 = vsel %vm2576_vm2, %v2584_v2, %v279_v3  ;;  %v302_v56 = vor.u32 %v301_v50, %v298_v45  ;;  %v2350_v1 = vld [vmem:[%s2989_s1 + $0x1a0] sm:$0xff]   ;;  %v2354_v45 = vld [vmem:[%s2989_s1 + $0x198] sm:$0xff]   ;;  %v2355_v50 = vld [vmem:[%s2989_s1 + $0x150] sm:$0xff]  }
  0x23   : > { %2077 = vmatpush3.bf16.msra.mxu0 %v2325_v22  ;;  %v1940_v13 = vcombine.low %v266_v6, %v280_v9  ;;  %v421_v22 = vrot.slane %v419_v5, 5  ;;  %v287_v34 = vrot.slane %v285_v21, 5  ;;  %v2680_v3 = vld [vmem:[%s2537_s6 + $0x80] sm:$0xff]  ;;  %v2694_v9 = vld [vmem:[%s2537_s6 + $0x90] sm:$0xff]  ;;  %v2351_v21 = vld [vmem:[%s2989_s1 + $0x158] sm:$0xff]  }
  0x24   : > { %2117 = vmatpush3.bf16.msra.mxu1 %v2326_v23  ;;  %2078 = vmatprep.subr.bf16.mxu0 %v2327_v24  ;;  %v2342_v23 = vld [vmem:[%s2989_s1 + $0x1b0] sm:$0xff]   ;;  %v245_v24 = vrot.slane %v2614_v16, 4  ;;  %v2671_v63 = vrot.slane %v302_v56, 4  ;;  %v246_v8 = vrot.slane %v2680_v3, 4  ;;  %v310_v11 = vshrl.u32 %v2680_v3, 16 }
  0x25   : > { %2118 = vmatprep.subr.bf16.mxu1 %v2328_v25  ;;  %v430_v25 = vshrl.u32 %v2618_v18, 16 }
  0x26   : > { %v1937_v32 = vcombine.low %v244_v17, %v245_v24 }
  0x27   : > { %2079 = vmatpush3.bf16.msra.mxu0 %v2329_v26  ;;  %v223_v26 = vld [vmem:[%s2537_s6 + $0x48] sm:$0x11] }
  0x28   : > { %2119 = vmatpush3.bf16.msra.mxu1 %v2330_v27  ;;  %2080 = vmatprep.subr.bf16.mxu0 %v2331_v28  ;;  %v433_v27 = vshll.u32 %v2618_v18, 16  ;;  %v1945_v28 = vcombine.low %v2618_v18, %v2621_v19  ;;  %v291_v36 = vshll.u32 %v223_v26, 16 }
  0x29   : > { %2120 = vmatprep.subr.bf16.mxu1 %v2332_v29  ;;  %v1933_v29 = vcombine.low %v2611_v15, %v2614_v16 }
  0x2a   : > { %v293_v49 = vrot.slane %v291_v36, 5 }
  0x2b   : > { %2081 = vmatpush3.bf16.msra.mxu0 %v2333_v30  ;;  %v225_v30 = vld [vmem:[%s2537_s6 + $0x68] sm:$0x11] }
  0x2c   : > { %2121 = vmatpush3.bf16.msra.mxu1 %v2334_v31  ;;  %2146 = vmatprep.subr.bf16.mxu0 %v2335_v38  ;;  %v284_v31 = vrot.slane %v282_v20, 4  ;;  %v2343_v38 = vld [vmem:[%s2989_s1 + $0x168] sm:$0xff]   ;;  %v305_v40 = vshll.u32 %v225_v30, 16  ;;  %v446_v30 = vrot.slane %v444_v43, 4 }
  0x2d   : > { %2186 = vmatprep.subr.bf16.mxu1 %v2336_v47  ;;  %v2344_v47 = vld [vmem:[%s2989_s1 + $0x1e8] sm:$0xff]  }
  0x2e   : > { %1414 = vmatmul.mubr.bf16.vlgmr.msra.gmra.mxu0 %v1932_v55  ;;  %v288_v44 = vor.u32 %v287_v34, %v284_v31  ;;  %v422_v55 = vor.u32 %v421_v22, %v2605_v12  ;;  %v307_v58 = vrot.slane %v305_v40, 5  ;;  %v313_v12 = vshll.u32 %v2680_v3, 16  ;;  %v227_v20 = vld [vmem:[%s2537_s6 + $0x88] sm:$0x11]  ;;  %v2353_v40 = vld [vmem:[%s2989_s1 + $0x118] sm:$0xff]  }
  0x2f   : > { %2147 = vmatpush3.bf16.msra.mxu0 %v2337_v62  ;;  %1479 = vmatmul.mubr.bf16.vlgmr.msra.gmra.mxu1 %v1940_v13  ;;  %v432_v22 = vrot.slane %v430_v25, 4  ;;  %v449_v31 = vrot.slane %v447_v60, 5  ;;  %v312_v34 = vrot.slane %v310_v11, 4  ;;  %v319_v25 = vshll.u32 %v227_v20, 16  ;;  %v2357_v60 = vld [vmem:[%s2989_s1 + $0x110] sm:$0xff]   ;;  %v2749_v11 = vld [vmem:[%s2537_s6 + $0xc0] sm:$0xff] }
  0x30   : > { %2148 = vmatprep.subr.bf16.mxu0 %v2339_v4  ;;  %2187 = vmatpush3.bf16.msra.mxu1 %v2338_v7  ;;  %v2653_v51 = vrot.slane %v288_v44, 4  ;;  %v2682_v4 = vrot.slane %v408_v54, 4  ;;  %v2684_v5 = vrot.slane %v422_v55, 4  ;;  %v308_v6 = vsel %vm2576_vm2, %v2671_v63, %v307_v58  ;;  %v2690_v7 = vld [vmem:[%s2537_s6 + $0xa0] sm:$0xff]  ;;  %v2356_v54 = vld [vmem:[%s2989_s1 + $0x1d0] sm:$0xff]  }
  0x31   : > { %2188 = vmatprep.subr.bf16.mxu1 %v2340_v14  ;;  %1486 = vmatprep.mubr.bf16.mxu1 %v1945_v28  ;;  %v247_v14 = vrot.slane %v2690_v7, 4  ;;  %v1934_v28 = vcombine.low %v2680_v3, %v2690_v7  ;;  %v315_v36 = vrot.slane %v313_v12, 5  ;;  %v324_v37 = vshrl.u32 %v2690_v7, 16  ;;  %v2752_v12 = vld [vmem:[%s2537_s6 + $0xe0] sm:$0xff] }
  0x32   : > { %1421 = vmatprep.mubr.bf16.mxu0 %v1937_v32  ;;  %v294_v62 = vsel %vm2576_vm2, %v2653_v51, %v293_v49  ;;  %v321_v44 = vrot.slane %v319_v25, 5  ;;  %v248_v20 = vrot.slane %v2749_v11, 4 }
  0x33   : > { %2149 = vmatpush3.bf16.msra.mxu0 %v2341_v10  ;;  %v2697_v10 = vld [vmem:[%s2537_s6 + $0xb0] sm:$0xff]  ;;  %v1941_v13 = vcombine.low %v294_v62, %v308_v6  ;;  %v1938_v32 = vcombine.low %v246_v8, %v247_v14  ;;  %v316_v43 = vor.u32 %v315_v36, %v312_v34  ;;  %v458_v62 = vshrl.u32 %v2694_v9, 16 }
  0x34   : > { %2150 = vmatprep.subr.bf16.mxu0 %v2343_v38  ;;  %2189 = vmatpush3.bf16.msra.mxu1 %v2342_v23  ;;  %v435_v23 = vrot.slane %v433_v27, 5  ;;  %v1946_v26 = vcombine.low %v2694_v9, %v2697_v10  ;;  %v2352_v27 = vld [vmem:[%s2989_s1 + $0x1d8] sm:$0xff]   ;;  %v327_v38 = vshll.u32 %v2690_v7, 16  ;;  %v2358_v6 = vld [vmem:[%s2989_s1 + $0x190] sm:$0xff]  }
  0x35   : > { %2190 = vmatprep.subr.bf16.mxu1 %v2344_v47  ;;  %v326_v47 = vrot.slane %v324_v37, 4 }
  0x36   : > { %1422 = vmatmul.mubr.bf16.gmra.mxu0 %v1933_v29  ;;  %v229_v29 = vld [vmem:[%s2537_s6 + $0xa8] sm:$0x11]  ;;  %v436_v56 = vor.u32 %v435_v23, %v432_v22  ;;  %v2760_v22 = vld [vmem:[%s2537_s6 + $0xd0] sm:$0xff] }
  0x37   : > { %2151 = vmatpush3.bf16.msra.mxu0 %v2345_v48  ;;  %1487 = vmatmul.mubr.bf16.gmra.mxu1 %v1941_v13  ;;  %v333_v39 = vshll.u32 %v229_v29, 16  ;;  %v329_v48 = vrot.slane %v327_v38, 5  ;;  %v2763_v23 = vld [vmem:[%s2537_s6 + $0xf0] sm:$0xff]  ;;  %v341_v38 = vshll.u32 %v2749_v11, 16 }
  0x38   : > { %2191 = vmatpush3.bf16.msra.mxu1 %v2346_v52  ;;  %2152 = vmatprep.subr.bf16.mxu0 %v2347_v59  ;;  %v2729_v52 = vrot.slane %v316_v43, 4  ;;  %v2773_v34 = vrot.slane %v436_v56, 4  ;;  %v1947_v25 = vcombine.low %v2760_v22, %v2763_v23  ;;  %v355_v43 = vshll.u32 %v2752_v12, 16 }
  0x39   : > { %2192 = vmatprep.subr.bf16.mxu1 %v2348_v61  ;;  %1494 = vmatprep.mubr.bf16.mxu1 %v1946_v26  ;;  %v335_v49 = vrot.slane %v333_v39, 5  ;;  %v330_v55 = vor.u32 %v329_v48, %v326_v47  ;;  %v450_v61 = vor.u32 %v449_v31, %v446_v30  ;;  %v231_v26 = vld [vmem:[%s2537_s6 + $0xc8] sm:$0x11]  ;;  %v1935_v30 = vcombine.low %v2749_v11, %v2752_v12 }
  0x3a   : > { %1429 = vmatprep.mubr.bf16.mxu0 %v1938_v32  ;;  %v322_v58 = vsel %vm2576_vm2, %v2729_v52, %v321_v44  ;;  %v233_v31 = vld [vmem:[%s2537_s6 + $0xe8] sm:$0x11]  ;;  %v347_v39 = vshll.u32 %v231_v26, 16 }
  0x3b   : > { %2153 = vmatpush3.bf16.msra.mxu0 %v2349_v0  ;;  %v2737_v59 = vrot.slane %v330_v55, 4  ;;  %v461_v0 = vshll.u32 %v2694_v9, 16  ;;  %v2359_v32 = vld [vmem:[%s2989_s1 + $0x148] sm:$0xff]   ;;  %v2782_v37 = vrot.slane %v450_v61, 4  ;;  %v357_v55 = vrot.slane %v355_v43, 5 }
  0x3c   : > { %2193 = vmatpush3.bf16.msra.mxu1 %v2350_v1  ;;  %2154 = vmatprep.subr.bf16.mxu0 %v2351_v21  ;;  %v472_v1 = vshrl.u32 %v2697_v10, 16  ;;  %v249_v21 = vrot.slane %v2752_v12, 4  ;;  %v2360_v47 = vld [vmem:[%s2989_s1 + $0x1c8] sm:$0xff]  }
  0x3d   : > { %2194 = vmatprep.subr.bf16.mxu1 %v2352_v27  ;;  %v336_v13 = vsel %vm2576_vm2, %v2737_v59, %v335_v49  ;;  %v338_v27 = vshrl.u32 %v2749_v11, 16  ;;  %v2361_v48 = vld [vmem:[%s2989_s1 + $0x108] sm:$0xff]   ;;  %v343_v49 = vrot.slane %v341_v38, 5  ;;  %v1903_v38 = vld [vmem:[%s2537_s6 + $0x38] sm:$0x11] }
  0x3e   : > { %1430 = vmatmul.mubr.bf16.gmra.mxu0 %v1934_v28  ;;  %v475_v28 = vshll.u32 %v2697_v10, 16  ;;  %v1942_v29 = vcombine.low %v322_v58, %v336_v13  ;;  %v1939_v36 = vcombine.low %v248_v20, %v249_v21  ;;  %v2362_v58 = vld [vmem:[%s2989_s1 + $0x188] sm:$0xff]   ;;  %v395_v13 = vrot.slane %v2618_v18, 4 }
  0x3f   : > { %2155 = vmatpush3.bf16.msra.mxu0 %v2353_v40  ;;  %v352_v40 = vshrl.u32 %v2752_v12, 16  ;;  %v340_v44 = vrot.slane %v338_v27, 4  ;;  %v1901_v27 = vld [vmem:[%s2537_s6 + $0x18] sm:$0x11] }
  0x40   : > { %2195 = vmatpush3.bf16.msra.mxu1 %v2354_v45  ;;  %2156 = vmatprep.subr.bf16.mxu0 %v2355_v50  ;;  %v361_v45 = vshll.u32 %v233_v31, 16  ;;  %v349_v50 = vrot.slane %v347_v39, 5  ;;  %v2365_v31 = vld [vmem:[%s2989_s1 + $0x100] sm:$0xff]   ;;  %v1960_v39 = vcombine.low %v243_v35, %v244_v17 }
  0x41   : > { %2196 = vmatprep.subr.bf16.mxu1 %v2356_v54  ;;  %1495 = vmatmul.mubr.bf16.gmra.mxu1 %v1942_v29  ;;  %v354_v54 = vrot.slane %v352_v40, 4  ;;  %v460_v40 = vrot.slane %v458_v62, 4  ;;  %v1905_v62 = vld [vmem:[%s2537_s6 + $0x58] sm:$0x11] }
  0x42   : > { %1437 = vmatprep.mubr.bf16.mxu0 %v1939_v36  ;;  %1502 = vmatprep.mubr.bf16.mxu1 %v1947_v25  ;;  %v363_v56 = vrot.slane %v361_v45, 5  ;;  %v2366_v25 = vld [vmem:[%s2989_s1 + $0x180] sm:$0xff]   ;;  %v425_v45 = vshll.u32 %v1903_v38, 16 }
  0x43   : > { %2157 = vmatpush3.bf16.msra.mxu0 %v2357_v60  ;;  %v344_v60 = vor.u32 %v343_v49, %v340_v44  ;;  %v358_v61 = vor.u32 %v357_v55, %v354_v54  ;;  %v411_v44 = vshll.u32 %v1901_v27, 16  ;;  %v486_v49 = vshrl.u32 %v2760_v22, 16 }
  0x44   : > { %2197 = vmatpush3.bf16.msra.mxu1 %v2358_v6  ;;  %2158 = vmatprep.subr.bf16.mxu0 %v2359_v32  ;;  %v2363_v6 = vld [vmem:[%s2989_s1 + $0x140] sm:$0xff]   ;;  %v427_v17 = vrot.slane %v425_v45, 5  ;;  %v1948_v54 = vcombine.low %v393_v46, %v394_v53  ;;  %v500_v55 = vshrl.u32 %v2763_v23, 16  ;;  %v474_v46 = vrot.slane %v472_v1, 4  ;;  %v1913_v45 = vld [vmem:[%s2537_s6 + $0xd8] sm:$0x11] }
  0x45   : > { %2198 = vmatprep.subr.bf16.mxu1 %v2360_v47  ;;  %v2800_v26 = vrot.slane %v344_v60, 4  ;;  %v2802_v29 = vrot.slane %v358_v61, 4  ;;  %v2367_v47 = vld [vmem:[%s2989_s1 + $0x238] sm:$0xff]   ;;  %v413_v35 = vrot.slane %v411_v44, 5  ;;  %v1956_v61 = vcombine.low %v2547_v33, %v2611_v15 }
  0x46   : > { %1438 = vmatmul.mubr.bf16.gmra.mxu0 %v1935_v30  ;;  %v2364_v30 = vld [vmem:[%s2989_s1 + $0x1c0] sm:$0xff]   ;;  %v428_v42 = vsel %vm2576_vm2, %v2684_v5, %v427_v17  ;;  %v503_v1 = vshll.u32 %v2763_v23, 16  ;;  %v1961_v15 = vcombine.low %v245_v24, %v246_v8  ;;  %v2369_v24 = vld [vmem:[%s2989_s1 + $0x228] sm:$0xff]   ;;  %v502_v17 = vrot.slane %v500_v55, 4 }
  0x47   : > { %2159 = vmatpush3.bf16.msra.mxu0 %v2361_v48  ;;  %v350_v32 = vsel %vm2576_vm2, %v2800_v26, %v349_v50  ;;  %v364_v36 = vsel %vm2576_vm2, %v2802_v29, %v363_v56  ;;  %v463_v48 = vrot.slane %v461_v0, 5  ;;  %v489_v50 = vshll.u32 %v2760_v22, 16  ;;  %v1907_v0 = vld [vmem:[%s2537_s6 + $0x78] sm:$0x11]  ;;  %v2370_v55 = vld [vmem:[%s2989_s1 + $0x220] sm:$0xff]  }
  0x48   : > { %2199 = vmatpush3.bf16.msra.mxu1 %v2362_v58  ;;  %2160 = vmatprep.subr.bf16.mxu0 %v2363_v6  ;;  %v1943_v43 = vcombine.low %v350_v32, %v364_v36  ;;  %v439_v56 = vshll.u32 %v1905_v62, 16  ;;  %v414_v60 = vsel %vm2576_vm2, %v2682_v4, %v413_v35  ;;  %v453_v41 = vshll.u32 %v1907_v0, 16  ;;  %v2368_v6 = vld [vmem:[%s2989_s1 + $0x230] sm:$0xff]   ;;  %v1911_v32 = vld [vmem:[%s2537_s6 + $0xb8] sm:$0x11] }
  0x49   : > { %2200 = vmatprep.subr.bf16.mxu1 %v2364_v30  ;;  %v464_v58 = vor.u32 %v463_v48, %v460_v40  ;;  %v1952_v53 = vcombine.low %v414_v60, %v428_v42  ;;  %v481_v27 = vshll.u32 %v1911_v32, 16  ;;  %v491_v35 = vrot.slane %v489_v50, 5 }
  0x4a   : > { %1503 = vmatmul.mubr.bf16.gmra.mxu1 %v1943_v43  ;;  %v441_v30 = vrot.slane %v439_v56, 5  ;;  %v455_v4 = vrot.slane %v453_v41, 5  ;;  %v505_v62 = vrot.slane %v503_v1, 5  ;;  %v1962_v42 = vcombine.low %v247_v14, %v248_v20  ;;  %v2371_v14 = vld [vmem:[%s2989_s1 + $0x218] sm:$0xff]  }
  0x4b   : > { %2161 = vmatpush3.bf16.msra.mxu0 %v2365_v31  ;;  %1608 = vmatprep.mubr.bf16.mxu1 %v1960_v39  ;;  %v1909_v31 = vld [vmem:[%s2537_s6 + $0x98] sm:$0x11]  ;;  %v465_v36 = vrot.slane %v464_v58, 4  ;;  %v483_v44 = vrot.slane %v481_v27, 5 }
  0x4c   : > { %2201 = vmatpush3.bf16.msra.mxu1 %v2366_v25  ;;  %2238 = vmatprep.subr.bf16.mxu0 %v2367_v47  ;;  %v467_v5 = vshll.u32 %v1909_v31, 16  ;;  %v477_v25 = vrot.slane %v475_v28, 5  ;;  %v442_v33 = vsel %vm2576_vm2, %v2773_v34, %v441_v30  ;;  %v456_v38 = vsel %vm2576_vm2, %v2782_v37, %v455_v4  ;;  %v1915_v34 = vld [vmem:[%s2537_s6 + $0xf8] sm:$0x11]  ;;  %v1925_v30 = vld [vmem:[%s2537_s6 + $0xa8] sm:$0x11] }
  0x4d   : > { %2262 = vmatprep.subr.bf16.mxu1 %v2367_v47  ;;  %1543 = vmatprep.mubr.bf16.mxu0 %v1952_v53  ;;  %v396_v28 = vrot.slane %v2621_v19, 4  ;;  %v1953_v43 = vcombine.low %v442_v33, %v456_v38  ;;  %v488_v37 = vrot.slane %v486_v49, 4  ;;  %v495_v19 = vshll.u32 %v1913_v45, 16  ;;  %v1919_v53 = vld [vmem:[%s2537_s6 + $0x48] sm:$0x11]  ;;  %v2372_v33 = vld [vmem:[%s2989_s1 + $0x210] sm:$0xff]  }
  0x4e   : > { %1544 = vmatmul.mubr.bf16.vlgmr.msra.gmra.mxu0 %v1948_v54  ;;  %v469_v39 = vrot.slane %v467_v5, 5  ;;  %v478_v40 = vor.u32 %v477_v25, %v474_v46  ;;  %v509_v54 = vshll.u32 %v1915_v34, 16  ;;  %v506_v50 = vor.u32 %v505_v62, %v502_v17  ;;  %v1917_v46 = vld [vmem:[%s2537_s6 + $0x28] sm:$0x11] }
  0x4f   : > { %2239 = vmatpush3.bf16.msra.mxu0 %v2367_v47  ;;  %1551 = vmatprep.mubr.bf16.mxu0 %v1953_v43  ;;  %v1949_v0 = vcombine.low %v395_v13, %v396_v28  ;;  %v492_v58 = vor.u32 %v491_v35, %v488_v37  ;;  %v497_v13 = vrot.slane %v495_v19, 5  ;;  %v1927_v31 = vld [vmem:[%s2537_s6 + $0xc8] sm:$0x11]  ;;  %v573_v4 = vshll.u32 %v1919_v53, 16 }
  0x50   : > { %2240 = vmatprep.subr.bf16.mxu0 %v2368_v6  ;;  %v470_v8 = vsel %vm2576_vm2, %v465_v36, %v469_v39  ;;  %v479_v48 = vrot.slane %v478_v40, 4  ;;  %v511_v60 = vrot.slane %v509_v54, 5  ;;  %v507_v41 = vrot.slane %v506_v50, 4  ;;  %v1921_v40 = vld [vmem:[%s2537_s6 + $0x68] sm:$0x11]  ;;  %v2374_v50 = vld [vmem:[%s2989_s1 + $0x200] sm:$0xff]  }
  0x51   : > { %v493_v18 = vrot.slane %v492_v58, 4  ;;  %v615_v25 = vshll.u32 %v1925_v30, 16  ;;  %v629_v1 = vshll.u32 %v1927_v31, 16  ;;  %v1958_v38 = vcombine.low %v2690_v7, %v2749_v11  ;;  %v1923_v43 = vld [vmem:[%s2537_s6 + $0x88] sm:$0x11] }
  0x52   : > { %1609 = vmatmul.mubr.bf16.vlgmr.msra.gmra.mxu1 %v1956_v61  ;;  %v484_v56 = vsel %vm2576_vm2, %v479_v48, %v483_v44  ;;  %v2895_v61 = vld [vmem:[%s2537_s6 + $0x100] sm:$0xff]  ;;  %v575_v39 = vrot.slane %v573_v4, 5  ;;  %v399_v34 = vrot.slane %v2760_v22, 4  ;;  %v1929_v7 = vld [vmem:[%s2537_s6 + $0xe8] sm:$0x11]  ;;  %v587_v37 = vshll.u32 %v1921_v40, 16 }
  0x53   : > { %2270 = vmatpush3.bf16.msra.mxu1 %v2367_v47  ;;  %1616 = vmatprep.mubr.bf16.mxu1 %v1961_v15  ;;  %v1954_v49 = vcombine.low %v470_v8, %v484_v56  ;;  %v1957_v47 = vcombine.low %v2614_v16, %v2680_v3  ;;  %v397_v16 = vrot.slane %v2694_v9, 4  ;;  %v398_v3 = vrot.slane %v2697_v10, 4  ;;  %v1931_v11 = vld [vmem:[%s2537_s6 + $0x108] sm:$0x11] }
  0x54   : > { %2263 = vmatprep.subr.bf16.mxu1 %v2368_v6  ;;  %2241 = vmatpush3.bf16.msra.mxu0 %v2368_v6  ;;  %v498_v20 = vsel %vm2576_vm2, %v493_v18, %v497_v13  ;;  %v512_v9 = vsel %vm2576_vm2, %v507_v41, %v511_v60  ;;  %v559_v10 = vshll.u32 %v1917_v46, 16  ;;  %v548_v32 = vrot.slane %v2895_v61, 4 }
  0x55   : > { %2242 = vmatprep.subr.bf16.mxu0 %v2369_v24  ;;  %v651_v36 = vshll.u32 %v2895_v61, 16  ;;  %v1950_v5 = vcombine.low %v397_v16, %v398_v3  ;;  %v1955_v15 = vcombine.low %v498_v20, %v512_v9  ;;  %v617_v8 = vrot.slane %v615_v25, 5 }
  0x56   : > { %1552 = vmatmul.mubr.bf16.gmra.mxu0 %v1949_v0  ;;  %v561_v28 = vrot.slane %v559_v10, 5  ;;  %v1963_v45 = vcombine.low %v249_v21, %v548_v32  ;;  %v631_v48 = vrot.slane %v629_v1, 5  ;;  %v601_v35 = vshll.u32 %v1923_v43, 16  ;;  %v2373_v21 = vld [vmem:[%s2989_s1 + $0x208] sm:$0xff]  }
  0x57   : > { %2271 = vmatpush3.bf16.msra.mxu1 %v2368_v6  ;;  %1559 = vmatprep.mubr.bf16.mxu0 %v1954_v49  ;;  %v648_v6 = vshrl.u32 %v2895_v61, 16  ;;  %v653_v44 = vrot.slane %v651_v36, 5  ;;  %v643_v17 = vshll.u32 %v1929_v7, 16  ;;  %v657_v62 = vshll.u32 %v1931_v11, 16 }
  0x58   : > { %2264 = vmatprep.subr.bf16.mxu1 %v2369_v24  ;;  %2243 = vmatpush3.bf16.msra.mxu0 %v2369_v24  ;;  %v562_v22 = vsel %vm2576_vm2, %v2584_v2, %v561_v28  ;;  %v618_v0 = vsel %vm2576_vm2, %v2737_v59, %v617_v8  ;;  %v632_v56 = vsel %vm2576_vm2, %v2800_v26, %v631_v48  ;;  %v589_v58 = vrot.slane %v587_v37, 5 }
  0x59   : > { %2244 = vmatprep.subr.bf16.mxu0 %v2370_v55  ;;  %v650_v27 = vrot.slane %v648_v6, 4  ;;  %v603_v49 = vrot.slane %v601_v35, 5  ;;  %v645_v59 = vrot.slane %v643_v17, 5  ;;  %v659_v18 = vrot.slane %v657_v62, 5 }
  0x5a   : > { %1617 = vmatmul.mubr.bf16.gmra.mxu1 %v1957_v47  ;;  %v590_v26 = vsel %vm2576_vm2, %v2671_v63, %v589_v58 }
  0x5b   : > { %2272 = vmatpush3.bf16.msra.mxu1 %v2369_v24  ;;  %1624 = vmatprep.mubr.bf16.mxu1 %v1962_v42  ;;  %v400_v24 = vrot.slane %v2763_v23, 4  ;;  %v576_v23 = vsel %vm2576_vm2, %v2653_v51, %v575_v39  ;;  %v654_v19 = vor.u32 %v653_v44, %v650_v27  ;;  %v1959_v51 = vcombine.low %v2752_v12, %v2895_v61 }
  0x5c   : > { %2265 = vmatprep.subr.bf16.mxu1 %v2370_v55  ;;  %2245 = vmatpush3.bf16.msra.mxu0 %v2370_v55  ;;  %v1964_v2 = vcombine.low %v562_v22, %v576_v23  ;;  %v604_v12 = vsel %vm2576_vm2, %v2729_v52, %v603_v49  ;;  %v646_v13 = vsel %vm2576_vm2, %v2802_v29, %v645_v59 }
  0x5d   : > { %2246 = vmatprep.subr.bf16.mxu0 %v2371_v14  ;;  %v1951_v54 = vcombine.low %v399_v34, %v400_v24  ;;  %v655_v47 = vrot.slane %v654_v19, 4  ;;  %v1965_v42 = vcombine.low %v590_v26, %v604_v12 }
  0x5e   : > { %1560 = vmatmul.mubr.bf16.gmra.mxu0 %v1950_v5 }
  0x5f   : > { %2273 = vmatpush3.bf16.msra.mxu1 %v2370_v55  ;;  %1567 = vmatprep.mubr.bf16.mxu0 %v1955_v15  ;;  %v1966_v55 = vcombine.low %v618_v0, %v632_v56  ;;  %v660_v60 = vsel %vm2576_vm2, %v655_v47, %v659_v18 }
  0x60   : > { %2266 = vmatprep.subr.bf16.mxu1 %v2371_v14  ;;  %2247 = vmatpush3.bf16.msra.mxu0 %v2371_v14  ;;  %v1967_v41 = vcombine.low %v646_v13, %v660_v60 }
  0x61   : > { %2248 = vmatprep.subr.bf16.mxu0 %v2372_v33 }
  0x62   : > { %1625 = vmatmul.mubr.bf16.gmra.mxu1 %v1958_v38 }
  0x63   : > { %2274 = vmatpush3.bf16.msra.mxu1 %v2371_v14  ;;  %1632 = vmatprep.mubr.bf16.mxu1 %v1963_v45 }
  0x64   : > { %2267 = vmatprep.subr.bf16.mxu1 %v2372_v33  ;;  %2249 = vmatpush3.bf16.msra.mxu0 %v2372_v33 }
  0x65   : > { %2250 = vmatprep.subr.bf16.mxu0 %v2373_v21 }
  0x66   : > { %1568 = vmatmul.mubr.bf16.gmra.mxu0 %v1951_v54 }
  0x67   : > { %2275 = vmatpush3.bf16.msra.mxu1 %v2372_v33  ;;  %2254 = vmatprep.mubr.bf16.mxu0 %v1964_v2 }
  0x68   : > { %2268 = vmatprep.subr.bf16.mxu1 %v2373_v21  ;;  %2251 = vmatpush3.bf16.msra.mxu0 %v2373_v21 }
  0x69   : > { %2252 = vmatprep.subr.bf16.mxu0 %v2374_v50 }
  0x6a   : > { %1633 = vmatmul.mubr.bf16.gmra.mxu1 %v1959_v51 }
  0x6b   : > { %2276 = vmatpush3.bf16.msra.mxu1 %v2373_v21  ;;  %2258 = vmatprep.mubr.bf16.mxu1 %v1966_v55 }
  0x6c   : > { %2269 = vmatprep.subr.bf16.mxu1 %v2374_v50  ;;  %2253 = vmatpush3.bf16.msra.mxu0 %v2374_v50 }
  0x6f   : > { %2277 = vmatpush3.bf16.msra.mxu1 %v2374_v50  ;;  %2255 = vmatmul.mubr.bf16.vlgmr.msra.gmra.mxu0 %v1965_v42 }
  0x72   : > { %2259 = vmatmul.mubr.bf16.vlgmr.msra.gmra.mxu1 %v1967_v41 }
  0xee   : > { %v2082_v63 = vpop.f32.mrf.mxu0 }
  0xef   : > { %v2122_v53 = vpop.f32.mrf.mxu1 }
  0xf0   : > { %v2083_v52 = vpop.f32.mrf.mxu0 }
  0xf1   : > { %v2123_v3 = vpop.f32.mrf.mxu1  ;;  %v2084_v50 = vadd.f32 %v2083_v52, %v2082_v63 }
  0xf2   : > { %v2085_v46 = vpop.f32.mrf.mxu0  ;;  %v2124_v47 = vadd.f32 %v2123_v3, %v2122_v53 }
  0xf3   : > { %v2125_v6 = vpop.f32.mrf.mxu1 }
  0xf4   : > { %v2086_v16 = vpop.f32.mrf.mxu0  ;;  %v1481_v52 = vadd.f32 %v2124_v47, %v2084_v50 }
  0xf5   : > { %v2126_v31 = vpop.f32.mrf.mxu1  ;;  %v2087_v55 = vadd.f32 %v2086_v16, %v2085_v46 }
  0xf6   : > { %v2088_v61 = vpop.f32.mrf.mxu0  ;;  %v2127_v59 = vadd.f32 %v2126_v31, %v2125_v6 }
  0xf7   : > { %v2128_v14 = vpop.f32.mrf.mxu1 }
  0xf8   : > { %v2089_v30 = vpop.f32.mrf.mxu0  ;;  %v1484_v63 = vadd.f32 %v2127_v59, %v2087_v55 }
  0xf9   : > { %v2129_v20 = vpop.f32.mrf.mxu1  ;;  %v2090_v12 = vadd.f32 %v2089_v30, %v2088_v61 }
  0xfa   : > { %v2091_v29 = vpop.f32.mrf.mxu0  ;;  %v2130_v13 = vadd.f32 %v2129_v20, %v2128_v14 }
  0xfb   : > { %v2131_v10 = vpop.f32.mrf.mxu1 }
  0xfc   : > { %v2092_v57 = vpop.f32.mrf.mxu0  ;;  %v1489_v46 = vadd.f32 %v2130_v13, %v2090_v12 }
  0xfd   : > { %v2132_v36 = vpop.f32.mrf.mxu1  ;;  %v2093_v60 = vadd.f32 %v2092_v57, %v2091_v29 }
  0xfe   : > { %v2953_v9 = vpop.f32.mrf.mxu0  ;;  %v2133_v42 = vadd.f32 %v2132_v36, %v2131_v10 }
  0xff   : > { %2994 = vst [vmem:[#allocation2_spill] sm:$0xff] %v2953_v9 }
 0x100   : > { %v2095_v4 = vpop.f32.mrf.mxu0  ;;  %v1492_v6 = vadd.f32 %v2133_v42, %v2093_v60 }
 0x101   : > { %v2134_v25 = vpop.f32.mrf.mxu1 }
 0x102   : > { %v2955_v32 = vpop.f32.mrf.mxu0 }
 0x103   : > { %2995 = vst [vmem:[#allocation3_spill] sm:$0xff] %v2955_v32  ;;  %v2135_v1 = vpop.f32.mrf.mxu1 }
 0x104   : > { %v2098_v5 = vpop.f32.mrf.mxu0  ;;  %v2136_v14 = vadd.f32 %v2135_v1, %v2134_v25 }
 0x105   : > { %v2137_v15 = vpop.f32.mrf.mxu1 }
 0x106   : > { %v2100_v33 = vpop.f32.mrf.mxu0  ;;  %v3000_v31 = vld [vmem:[#allocation2_spill] sm:$0xff] }
 0x107   : > { %v2138_v38 = vpop.f32.mrf.mxu1  ;;  %v2096_v30 = vadd.f32 %v2095_v4, %v3000_v31 }
 0x108   : > { %v2101_v27 = vpop.f32.mrf.mxu0  ;;  %v2139_v20 = vadd.f32 %v2138_v38, %v2137_v15 }
 0x109   : > { %v2102_v41 = vadd.f32 %v2101_v27, %v2100_v33  ;;  %v1497_v1 = vadd.f32 %v2136_v14, %v2096_v30 }
 0x10a   : > { %v2103_v28 = vpop.f32.mrf.mxu0  ;;  %v2140_v39 = vpop.f32.mrf.mxu1  ;;  %v3001_v29 = vld [vmem:[#allocation3_spill] sm:$0xff] }
 0x10b   : > { %v2099_v57 = vadd.f32 %v2098_v5, %v3001_v29 }
 0x10c   : > { %v2141_v40 = vpop.f32.mrf.mxu1  ;;  %v2104_v43 = vpop.f32.mrf.mxu0 }
 0x10d   : > { %v1500_v5 = vadd.f32 %v2139_v20, %v2099_v57 }
 0x10e   : > { %v2143_v44 = vpop.f32.mrf.mxu1  ;;  %v2162_v34 = vpop.f32.mrf.mxu0 }
 0x110   : > { %v2144_v45 = vpop.f32.mrf.mxu1  ;;  %v2163_v8 = vpop.f32.mrf.mxu0 }
 0x111   : > { %v2145_v32 = vadd.f32 %v2144_v45, %v2143_v44  ;;  %v2164_v10 = vadd.f32 %v2163_v8, %v2162_v34 }
 0x112   : > { %v2957_v24 = vpop.f32.mrf.mxu1  ;;  %v2165_v7 = vpop.f32.mrf.mxu0 }
 0x113   : > { %2996 = vst [vmem:[#allocation4_spill] sm:$0xff] %v2957_v24  ;;  %v2105_v24 = vadd.f32 %v2104_v43, %v2103_v28  ;;  %v1546_v15 = vadd.f32 %v2164_v10, %v1481_v52 }
 0x114   : > { %v2959_v48 = vpop.f32.mrf.mxu1  ;;  %v2166_v37 = vpop.f32.mrf.mxu0 }
 0x115   : > { %2997 = vst [vmem:[#allocation5_spill] sm:$0xff] %v2959_v48  ;;  %v2142_v48 = vadd.f32 %v2141_v40, %v2140_v39  ;;  %v1508_v28 = vadd.f32 %v2145_v32, %v2105_v24  ;;  %v2167_v39 = vadd.f32 %v2166_v37, %v2165_v7 }
 0x116   : > { %v2961_v11 = vpop.f32.mrf.mxu1  ;;  %v2168_v21 = vpop.f32.mrf.mxu0 }
 0x117   : > { %2998 = vst [vmem:[#allocation6_spill] sm:$0xff] %v2961_v11  ;;  %v1505_v27 = vadd.f32 %v2142_v48, %v2102_v41 }
 0x118   : > { %v2963_v35 = vpop.f32.mrf.mxu1  ;;  %v2169_v23 = vpop.f32.mrf.mxu0 }
 0x119   : > { %2999 = vst [vmem:[#allocation7_spill] sm:$0xff] %v2963_v35  ;;  %v2170_v9 = vadd.f32 %v2169_v23, %v2168_v21 }
 0x11a   : > { %v2208_v22 = vpop.f32.mrf.mxu1  ;;  %v2171_v17 = vpop.f32.mrf.mxu0  ;;  %v3002_v38 = vld [vmem:[#allocation4_spill] sm:$0xff] }
 0x11b   : > { %v1554_v40 = vadd.f32 %v2170_v9, %v1489_v46  ;;  %v1549_v9 = vadd.f32 %v2167_v39, %v1484_v63 }
 0x11c   : > { %v2209_v19 = vpop.f32.mrf.mxu1  ;;  %v2172_v54 = vpop.f32.mrf.mxu0  ;;  %v3003_v34 = vld [vmem:[#allocation5_spill] sm:$0xff] }
 0x11d   : > { %v2173_v3 = vadd.f32 %v2172_v54, %v2171_v17  ;;  %v2210_v43 = vadd.f32 %v2209_v19, %v2208_v22  ;;  %v2204_v8 = vadd.f32 %v3003_v34, %v3002_v38 }
 0x11e   : > { %v2211_v62 = vpop.f32.mrf.mxu1  ;;  %v2174_v56 = vpop.f32.mrf.mxu0  ;;  %v3004_v48 = vld [vmem:[#allocation6_spill] sm:$0xff] }
 0x11f   : > { %v1557_v44 = vadd.f32 %v2173_v3, %v1492_v6  ;;  %v1611_v12 = vadd.f32 %v2204_v8, %v1546_v15 }
 0x120   : > { %v2212_v0 = vpop.f32.mrf.mxu1  ;;  %v2175_v58 = vpop.f32.mrf.mxu0  ;;  %v3005_v7 = vld [vmem:[#allocation7_spill] sm:$0xff] }
 0x121   : > { %v2213_v45 = vadd.f32 %v2212_v0, %v2211_v62  ;;  %v2176_v21 = vadd.f32 %v2175_v58, %v2174_v56  ;;  %v2207_v37 = vadd.f32 %v3005_v7, %v3004_v48  ;;  %v1619_v56 = vadd.f32 %v2210_v43, %v1554_v40 }
 0x122   : > { %v2214_v2 = vpop.f32.mrf.mxu1  ;;  %v2177_v51 = vpop.f32.mrf.mxu0 }
 0x123   : > { %v1562_v62 = vadd.f32 %v2176_v21, %v1497_v1  ;;  %v1622_v50 = vadd.f32 %v2213_v45, %v1557_v44 }
 0x124   : > { %v2215_v49 = vpop.f32.mrf.mxu1  ;;  %v2178_v26 = vpop.f32.mrf.mxu0 }
 0x125   : > { %v2179_v54 = vadd.f32 %v2178_v26, %v2177_v51  ;;  %v2216_v0 = vadd.f32 %v2215_v49, %v2214_v2  ;;  %v1614_v49 = vadd.f32 %v2207_v37, %v1549_v9 }
 0x126   : > { %v2217_v18 = vpop.f32.mrf.mxu1  ;;  %v2180_v11 = vpop.f32.mrf.mxu0 }
 0x127   : > { %v1565_v47 = vadd.f32 %v2179_v54, %v1500_v5  ;;  %v1627_v63 = vadd.f32 %v2216_v0, %v1562_v62 }
 0x128   : > { %v2218_v35 = vpop.f32.mrf.mxu1  ;;  %v2181_v16 = vpop.f32.mrf.mxu0 }
 0x129   : > { %v2182_v61 = vadd.f32 %v2181_v16, %v2180_v11  ;;  %v2219_v55 = vadd.f32 %v2218_v35, %v2217_v18 }
 0x12a   : > { %v2220_v53 = vpop.f32.mrf.mxu1  ;;  %v2183_v33 = vpop.f32.mrf.mxu0 }
 0x12b   : > { %v1570_v4 = vadd.f32 %v2182_v61, %v1505_v27  ;;  %v1630_v18 = vadd.f32 %v2219_v55, %v1565_v47 }
 0x12c   : > { %v2221_v36 = vpop.f32.mrf.mxu1  ;;  %v2184_v17 = vpop.f32.mrf.mxu0 }
 0x12d   : > { %v2222_v11 = vadd.f32 %v2221_v36, %v2220_v53  ;;  %v2185_v25 = vadd.f32 %v2184_v17, %v2183_v33 }
 0x12e   : > { %v2223_v23 = vpop.f32.mrf.mxu1 }
 0x12f   : > { %v2256_v24 = vpop.f32.mrf.mxu0  ;;  %v1573_v22 = vadd.f32 %v2185_v25, %v1508_v28  ;;  %v1635_v59 = vadd.f32 %v2222_v11, %v1570_v4 }
 0x130   : > { %v2224_v32 = vpop.f32.mrf.mxu1  ;;  %v1684_v42 = vadd.f32 %v2256_v24, %v1619_v56 }
 0x131   : > { %v2225_v19 = vadd.f32 %v2224_v32, %v2223_v23  ;;  %v1675_v51 = vpop.f32.mrf.mxu0 }
 0x132   : > { %v2260_v58 = vpop.f32.mrf.mxu1  ;;  %v1676_v52 = vadd.f32 %v1675_v51, %v1611_v12  ;;  %v1737_v36 = vmul.f32 %v1684_v42, %v1684_v42 }
 0x133   : > { %v1638_v26 = vadd.f32 %v2225_v19, %v1573_v22  ;;  %v2257_v60 = vpop.f32.mrf.mxu0  ;;  %v1700_v53 = vadd.f32 %v2260_v58, %v1635_v59 }
 0x134   : > { %v1691_v13 = vpop.f32.mrf.mxu1  ;;  %v1687_v41 = vadd.f32 %v2257_v60, %v1622_v50  ;;  %v1735_v14 = vmul.f32 %v1676_v52, %v1676_v52 }
 0x135   : > { %v1678_v3 = vpop.f32.mrf.mxu0  ;;  %v1692_v31 = vadd.f32 %v1691_v13, %v1627_v63  ;;  %v1741_v54 = vmul.f32 %v1700_v53, %v1700_v53 }
 0x136   : > { %v2261_v2 = vpop.f32.mrf.mxu1  ;;  %v2051_v16 = vpack.c.bf16 %v1687_v41, %v1684_v42  ;;  %v1679_v46 = vadd.f32 %v1678_v3, %v1614_v49  ;;  %v1738_v28 = vmul.f32 %v1687_v41, %v1687_v41 }
 0x137   : > { %v1703_v35 = vadd.f32 %v2261_v2, %v1638_v26  ;;  %v1739_v43 = vmul.f32 %v1692_v31, %v1692_v31 }
 0x138   : > { %v1694_v6 = vpop.f32.mrf.mxu1  ;;  %2063 = vst [vmem:[%s204_s4 + $0x8] sm:$0xff] %v2051_v16   ;;  %v2046_v29 = vpack.c.bf16 %v1679_v46, %v1676_v52  ;;  %v1722_v57 = vadd.f32 %v1679_v46, %v1676_v52  ;;  %v1736_v20 = vmul.f32 %v1679_v46, %v1679_v46 }
 0x139   : > { %v2061_v30 = vpack.c.bf16 %v1703_v35, %v1700_v53  ;;  %v1695_v61 = vadd.f32 %v1694_v6, %v1630_v18  ;;  %v1742_v25 = vmul.f32 %v1703_v35, %v1703_v35 }
 0x13a   : > { %2047 = vst [vmem:[%s204_s4] sm:$0xff] %v2046_v29   ;;  %v1723_v33 = vadd.f32 %v1722_v57, %v1684_v42  ;;  %v1743_v27 = vadd.f32 %v1736_v20, %v1735_v14 }
 0x13b   : > { %2065 = vst [vmem:[%s204_s4 + $0x18] sm:$0xff] %v2061_v30   ;;  %v2056_v10 = vpack.c.bf16 %v1695_v61, %v1692_v31  ;;  %v1740_v23 = vmul.f32 %v1695_v61, %v1695_v61 }
 0x13c   : > { %v1744_v39 = vadd.f32 %v1743_v27, %v1737_v36  ;;  %v1724_v40 = vadd.f32 %v1723_v33, %v1687_v41 }
 0x13d   : > { %2064 = vst [vmem:[%s204_s4 + $0x10] sm:$0xff] %v2056_v10  }
 0x13e   : > { %v1725_v44 = vadd.f32 %v1724_v40, %v1692_v31  ;;  %v1745_v45 = vadd.f32 %v1744_v39, %v1738_v28 }
 0x140   : > { %v1726_v21 = vadd.f32 %v1725_v44, %v1695_v61  ;;  %v1746_v17 = vadd.f32 %v1745_v45, %v1739_v43 }
 0x142   : > { %v1727_v4 = vadd.f32 %v1726_v21, %v1700_v53  ;;  %v1747_v11 = vadd.f32 %v1746_v17, %v1740_v23 }
 0x144   : > { %v1728_v1 = vadd.f32 %v1727_v4, %v1703_v35  ;;  %v1748_v5 = vadd.f32 %v1747_v11, %v1741_v54 }
 0x146   : > { %v1729_v15 = vrot.slane %v1728_v1, 4  ;;  %v1749_v38 = vadd.f32 %v1748_v5, %v1742_v25 }
 0x148   : > { %v1730_v34 = vadd.f32 %v1729_v15, %v1728_v1  ;;  %v1750_v8 = vrot.slane %v1749_v38, 4 }
 0x14a   : > { %v1731_v32 = vrot.slane %v1730_v34, 2  ;;  %v1751_v24 = vadd.f32 %v1750_v8, %v1749_v38 }
 0x14c   : > { %v1732_v9 = vadd.f32 %v1731_v32, %v1730_v34  ;;  %v1752_v48 = vrot.slane %v1751_v24, 2 }
 0x14e   : > { %v1733_v7 = vrot.slane %v1732_v9, 1  ;;  %v1753_v37 = vadd.f32 %v1752_v48, %v1751_v24 }
 0x150   : > { %v1754_v22 = vrot.slane %v1753_v37, 1  ;;  %v1734_v19 = vadd.f32 %v1733_v7, %v1732_v9 }
 0x152   : > { %v1755_v62 = vadd.f32 %v1754_v22, %v1753_v37 }
 0x154   : > { %v1757_v0 = vsel %vm1756_vm3, %v1734_v19, %v1755_v62 }
 0x155   : > { %1758 = vst [vmem:[%s212_s9] sm:$0x3] %v1757_v0 }
 0x156 PF: > { %s14_s14 = sadd.s32 1, %s2397_s14   ;;  %s3006_s12 = smov %s2393_s13 }
 0x157   : > { %p11_p5 = scmp.ge.s32.totalorder %s14_s14, 4   ;;  %s3007_s13 = smov %s3009_s15 }
 0x159   :  { %13 = sbr.rel (!%p11_p5) target bundleno = 2 (0x2), region = 73 }

</bundles_post_ra>
